<compile_context>
chip_gen: v7x
topology: tpu7x:2x2x1
jax: 0.10.0
libtpu: 0.0.40
codegen_flags: <defaults>
</compile_context>

<pallas_src>
import functools

import jax
import jax.numpy as jnp
from jax.experimental import pallas as pl
from jax.experimental.pallas import tpu as pltpu

BN_EPS = 1e-5
HP = jax.lax.Precision.HIGHEST


def _stgcn_block_kernel(x_ref, gw_ref, gb_ref, tw_ref, tb_ref, o_ref, gpad_ref,
                        *, n_batch, t_len, t_blk, w_off, r_off, k_taps):
    """Fused STGCNBlock forward on 2-D operands (rows=(n,t), cols=(c,v)).

    x_ref   : (N*T,  C*V)    input (also the identity residual)
    gw_ref  : (C*V,  C*V)    folded GCN weight  sum_k kron(W1_k^T, A_k) * bn_scale
    gb_ref  : (1,    C*V)    folded GCN column bias (conv bias through A & BN)
    tw_ref  : (KT, C*V, C*V) folded per-tap TCN weights kron(Wt_dt^T, I_V)*bn_scale
    tb_ref  : (1,    C*V)    folded TCN column bias
    o_ref   : (N*T,  C*V)    output
    gpad_ref: (N*t_blk, C*V) VMEM scratch: temporally zero-padded GCN output
    """
    # ---- unit_gcn: one MXU matmul + bias + ReLU ------------------------------
    ga = jnp.dot(x_ref[...], gw_ref[...], preferred_element_type=jnp.float32)
    ga = jnp.maximum(ga + gb_ref[...], 0.0)

    # ---- per-sample zero-padded temporal buffer (sublane-aligned writes) -----
    gpad_ref[...] = jnp.zeros_like(gpad_ref)
    for n in range(n_batch):
        gpad_ref[n * t_blk + w_off:n * t_blk + w_off + t_len, :] = \
            ga[n * t_len:(n + 1) * t_len, :]

    # ---- unit_tcn (k_taps temporal taps) + identity residual + final ReLU ----
    for n in range(n_batch):
        blk = gpad_ref[n * t_blk:(n + 1) * t_blk, :]                 # (t_blk, C*V)
        acc = tb_ref[...] + x_ref[n * t_len:(n + 1) * t_len, :]      # bias + res
        for dt in range(k_taps):
            acc = acc + jnp.dot(blk[r_off + dt:r_off + dt + t_len, :], tw_ref[dt],
                                preferred_element_type=jnp.float32)
        o_ref[n * t_len:(n + 1) * t_len, :] = \
            jnp.maximum(acc, 0.0).astype(o_ref.dtype)


@jax.jit
def stgcn_block_forward(x, params):
    """STGCNBlock.forward (eval): relu(tcn(gcn(x, A)) + x)."""
    N, C_in, T, V = x.shape
    K = params["A"].shape[0]
    C_out = params["gcn_w"].shape[0] // K
    KT = params["tcn_w"].shape[2]
    assert C_in == C_out, "identity-residual path needs in_channels == out_channels"
    # TODO(synk): stride > 1 / channel-changing residual (1x1 unit_tcn residual)
    # and the mstcn tcn_type branch are not implemented in this kernel.

    pad = (KT - 1) // 2                       # temporal conv padding (=4 for k=9)
    pad_rows = ((pad + 7) // 8) * 8           # round up so scratch writes stay aligned
    t_blk = T + 2 * pad_rows                  # padded frames per sample in scratch
    cv = C_out * V

    # ---------- one-time parameter folding (eval-mode BN -> affine) -----------
    a_eff = params["A"] * params["PA"]                      # adaptive='importance'
    sg = params["gcn_bn_gamma"] * jax.lax.rsqrt(params["gcn_bn_var"] + BN_EPS)
    hg = params["gcn_bn_beta"] - params["gcn_bn_mean"] * sg
    w1 = params["gcn_w"].reshape(K, C_out, C_in)            # [k, c_out, c_in]
    # big_w[(ci,v),(c,w)] = bn_scale[c] * sum_k W1[k*C+c, ci] * A_eff[k, v, w]
    big_w = jnp.einsum("kci,kvw->ivcw", w1, a_eff, precision=HP)
    big_w = (big_w * sg[None, None, :, None]).reshape(C_in * V, cv)
    colsum = a_eff.sum(axis=1)                              # [k, w]
    b1 = params["gcn_b"].reshape(K, C_out)
    gcn_bias = (jnp.einsum("kc,kw->cw", b1, colsum, precision=HP)
                * sg[:, None] + hg[:, None]).reshape(1, cv)

    st = params["tcn_bn_gamma"] * jax.lax.rsqrt(params["tcn_bn_var"] + BN_EPS)
    ht = params["tcn_bn_beta"] - params["tcn_bn_mean"] * st
    wt = params["tcn_w"] * st[:, None, None]                # [c_out, c_in, kt]
    eye_v = jnp.eye(V, dtype=x.dtype)
    # tcn_w[dt, (ci,v), (o,w)] = bn_scale[o] * Wt[o, ci, dt] * delta(v, w)
    tcn_w = jnp.einsum("oid,vw->divow", wt, eye_v,
                       precision=HP).reshape(KT, C_in * V, cv)
    tcn_bias = jnp.repeat(st * params["tcn_b"] + ht, V).reshape(1, cv)

    # ---------- activations: rows=(n,t), cols=(channel, vertex) ---------------
    x2d = x.transpose(0, 2, 1, 3).reshape(N * T, C_in * V)

    kernel = functools.partial(
        _stgcn_block_kernel, n_batch=N, t_len=T, t_blk=t_blk,
        w_off=pad_rows, r_off=pad_rows - pad, k_taps=KT)
    vmem = pl.BlockSpec(memory_space=pltpu.MemorySpace.VMEM)
    out2d = pl.pallas_call(
        kernel,
        out_shape=jax.ShapeDtypeStruct((N * T, cv), x.dtype),
        in_specs=[vmem] * 5,
        out_specs=vmem,
        scratch_shapes=[pltpu.VMEM((N * t_blk, cv), jnp.float32)],
    )(x2d, big_w, gcn_bias, tcn_w, tcn_bias)

    return out2d.reshape(N, T, C_out, V).transpose(0, 2, 1, 3)


# ----------------------------- plain-JAX reference -----------------------------
def stgcn_block_reference(x, p):
    N, C_in, T, V = x.shape
    K = p["A"].shape[0]
    C_out = p["gcn_w"].shape[0] // K
    a_eff = p["A"] * p["PA"]
    # unit_gcn (conv_pos='pre', adaptive='importance', with_res=False), eval BN
    y = jnp.einsum("oc,nctv->notv", p["gcn_w"], x,
                   precision=HP) + p["gcn_b"][None, :, None, None]
    y = y.reshape(N, K, C_out, T, V)
    g = jnp.einsum("nkctv,kvw->nctw", y, a_eff, precision=HP)
    sg = p["gcn_bn_gamma"] / jnp.sqrt(p["gcn_bn_var"] + BN_EPS)
    hg = p["gcn_bn_beta"] - p["gcn_bn_mean"] * sg
    ga = jax.nn.relu(g * sg[None, :, None, None] + hg[None, :, None, None])
    # unit_tcn: Conv2d (9,1), pad (4,0), stride 1, then eval BN (dropout p=0)
    KT = p["tcn_w"].shape[2]
    pad = (KT - 1) // 2
    gp = jnp.pad(ga, ((0, 0), (0, 0), (pad, pad), (0, 0)))
    tc = p["tcn_b"][None, :, None, None] + sum(
        jnp.einsum("oi,nitw->notw", p["tcn_w"][:, :, dt], gp[:, :, dt:dt + T, :],
                   precision=HP) for dt in range(KT))
    st = p["tcn_bn_gamma"] / jnp.sqrt(p["tcn_bn_var"] + BN_EPS)
    ht = p["tcn_bn_beta"] - p["tcn_bn_mean"] * st
    tb = tc * st[None, :, None, None] + ht[None, :, None, None]
    return jax.nn.relu(tb + x)            # identity residual + final ReLU


def init_stgcn_block_params(key, c_in, c_out, k_sub, v, kt=9):
    ks = jax.random.split(key, 12)
    u = lambda kk, shape, lo, hi: jax.random.uniform(kk, shape, jnp.float32, lo, hi)
    bg = 1.0 / jnp.sqrt(c_in)          # 1x1 conv fan-in
    bt = 1.0 / jnp.sqrt(c_out * kt)    # (kt,1) conv fan-in
    return {
        "A": jax.random.normal(ks[0], (k_sub, v, v), jnp.float32) / jnp.sqrt(v),
        "PA": 1.0 + 0.05 * jax.random.normal(ks[1], (k_sub, v, v), jnp.float32),
        "gcn_w": u(ks[2], (k_sub * c_out, c_in), -bg, bg),
        "gcn_b": u(ks[3], (k_sub * c_out,), -bg, bg),
        "gcn_bn_gamma": u(ks[4], (c_out,), 0.5, 1.5),
        "gcn_bn_beta": u(ks[5], (c_out,), -0.5, 0.5),
        "gcn_bn_mean": 0.1 * jax.random.normal(ks[6], (c_out,), jnp.float32),
        "gcn_bn_var": u(ks[7], (c_out,), 0.5, 1.5),
        "tcn_w": u(ks[8], (c_out, c_out, kt), -bt, bt),
        "tcn_b": u(ks[9], (c_out,), -bt, bt),
        "tcn_bn_gamma": u(ks[10], (c_out,), 0.5, 1.5),
        "tcn_bn_beta": u(ks[11], (c_out,), -0.5, 0.5),
        "tcn_bn_mean": jnp.zeros((c_out,), jnp.float32),
        "tcn_bn_var": jnp.ones((c_out,), jnp.float32),
    }


if __name__ == "__main__":
    key = jax.random.PRNGKey(0)
    k_param, k_x = jax.random.split(key)

    # Small shapes; C*V = 8*16 = 128 makes the fused column axis lane-dense.
    N, C, T, V, K = 2, 8, 8, 16, 3
    params = init_stgcn_block_params(k_param, C, C, K, V)
    x = jax.random.normal(k_x, (N, C, T, V), dtype=jnp.float32)

    out = stgcn_block_forward(x, params)
    out = jax.block_until_ready(out)

    ref = stgcn_block_reference(x, params)
    assert out.shape == (N, C, T, V)
    max_diff = float(jnp.max(jnp.abs(out - ref)))
    assert jnp.allclose(out, ref, atol=5e-2, rtol=0.0), f"max abs diff {max_diff}"

    print("KERNEL_OK")
</pallas_src>

<mosaic_0001>
module attributes {stable_mosaic.version = 11 : i64} {
  func.func @_stgcn_block_kernel(%arg0: memref<16x128xf32, #tpu.memory_space<vmem>>, %arg1: memref<128x128xf32, #tpu.memory_space<vmem>>, %arg2: memref<1x128xf32, #tpu.memory_space<vmem>>, %arg3: memref<9x128x128xf32, #tpu.memory_space<vmem>>, %arg4: memref<1x128xf32, #tpu.memory_space<vmem>>, %arg5: memref<16x128xf32, #tpu.memory_space<vmem>>, %arg6: memref<48x128xf32, #tpu.memory_space<vmem>>) attributes {dimension_semantics = [], scalar_prefetch = 0 : i64, scratch_operands = 1 : i64, tpu.core_type = #tpu.core_type<tc>} {
    %c0 = arith.constant 0 : index
    %c0_0 = arith.constant 0 : index
    %0 = vector.load %arg0[%c0, %c0_0] : memref<16x128xf32, #tpu.memory_space<vmem>>, vector<16x128xf32>
    %c0_1 = arith.constant 0 : index
    %c0_2 = arith.constant 0 : index
    %1 = vector.load %arg1[%c0_1, %c0_2] : memref<128x128xf32, #tpu.memory_space<vmem>>, vector<128x128xf32>
    %cst = arith.constant dense<0.000000e+00> : vector<16x128xf32>
    %2 = tpu.matmul %0, %1, %cst {dimension_numbers = #tpu.dot_dimension_numbers<[1], [0], [0], [1], [0, 0, 1, 1], [], []>} : vector<16x128xf32>, vector<128x128xf32>, vector<16x128xf32> -> vector<16x128xf32>
    %c0_3 = arith.constant 0 : index
    %c0_4 = arith.constant 0 : index
    %3 = vector.load %arg2[%c0_3, %c0_4] : memref<1x128xf32, #tpu.memory_space<vmem>>, vector<1x128xf32>
    %4 = vector.broadcast %3 : vector<1x128xf32> to vector<16x128xf32>
    %5 = arith.addf %2, %4 : vector<16x128xf32>
    %cst_5 = arith.constant 0.000000e+00 : f32
    %6 = vector.broadcast %cst_5 : f32 to vector<16x128xf32>
    %7 = arith.maximumf %5, %6 : vector<16x128xf32>
    %cst_6 = arith.constant 0.000000e+00 : f32
    %8 = vector.broadcast %cst_6 : f32 to vector<48x128xf32>
    %c0_7 = arith.constant 0 : index
    %c0_8 = arith.constant 0 : index
    %9 = vector.load %arg6[%c0_7, %c0_8] : memref<48x128xf32, #tpu.memory_space<vmem>>, vector<48x128xf32>
    tpu.vector_store %arg6[%c0_7, %c0_8], %8 {strides = array<i32>} : memref<48x128xf32, #tpu.memory_space<vmem>>, vector<48x128xf32>,
    %10 = vector.extract_strided_slice %7 {offsets = [0, 0], sizes = [8, 128], strides = [1, 1]} : vector<16x128xf32> to vector<8x128xf32>
    %c8 = arith.constant 8 : index
    %c0_9 = arith.constant 0 : index
    %11 = vector.load %arg6[%c8, %c0_9] : memref<48x128xf32, #tpu.memory_space<vmem>>, vector<8x128xf32>
    tpu.vector_store %arg6[%c8, %c0_9], %10 {strides = array<i32>} : memref<48x128xf32, #tpu.memory_space<vmem>>, vector<8x128xf32>,
    %12 = vector.extract_strided_slice %7 {offsets = [8, 0], sizes = [8, 128], strides = [1, 1]} : vector<16x128xf32> to vector<8x128xf32>
    %c32 = arith.constant 32 : index
    %c0_10 = arith.constant 0 : index
    %13 = vector.load %arg6[%c32, %c0_10] : memref<48x128xf32, #tpu.memory_space<vmem>>, vector<8x128xf32>
    tpu.vector_store %arg6[%c32, %c0_10], %12 {strides = array<i32>} : memref<48x128xf32, #tpu.memory_space<vmem>>, vector<8x128xf32>,
    %c0_11 = arith.constant 0 : index
    %c0_12 = arith.constant 0 : index
    %14 = vector.load %arg6[%c0_11, %c0_12] : memref<48x128xf32, #tpu.memory_space<vmem>>, vector<24x128xf32>
    %c0_13 = arith.constant 0 : index
    %c0_14 = arith.constant 0 : index
    %15 = vector.load %arg4[%c0_13, %c0_14] : memref<1x128xf32, #tpu.memory_space<vmem>>, vector<1x128xf32>
    %c0_15 = arith.constant 0 : index
    %c0_16 = arith.constant 0 : index
    %16 = vector.load %arg0[%c0_15, %c0_16] : memref<16x128xf32, #tpu.memory_space<vmem>>, vector<8x128xf32>
    %17 = vector.broadcast %15 : vector<1x128xf32> to vector<8x128xf32>
    %18 = arith.addf %17, %16 : vector<8x128xf32>
    %19 = vector.extract_strided_slice %14 {offsets = [4, 0], sizes = [8, 128], strides = [1, 1]} : vector<24x128xf32> to vector<8x128xf32>
    %c0_17 = arith.constant 0 : index
    %c0_18 = arith.constant 0 : index
    %c0_19 = arith.constant 0 : index
    %20 = vector.load %arg3[%c0_17, %c0_18, %c0_19] : memref<9x128x128xf32, #tpu.memory_space<vmem>>, vector<1x128x128xf32>
    %21 = vector.shape_cast %20 : vector<1x128x128xf32> to vector<128x128xf32>
    %cst_20 = arith.constant dense<0.000000e+00> : vector<8x128xf32>
    %22 = tpu.matmul %19, %21, %cst_20 {dimension_numbers = #tpu.dot_dimension_numbers<[1], [0], [0], [1], [0, 0, 1, 1], [], []>} : vector<8x128xf32>, vector<128x128xf32>, vector<8x128xf32> -> vector<8x128xf32>
    %23 = arith.addf %18, %22 : vector<8x128xf32>
    %24 = vector.extract_strided_slice %14 {offsets = [5, 0], sizes = [8, 128], strides = [1, 1]} : vector<24x128xf32> to vector<8x128xf32>
    %c1 = arith.constant 1 : index
    %c0_21 = arith.constant 0 : index
    %c0_22 = arith.constant 0 : index
    %25 = vector.load %arg3[%c1, %c0_21, %c0_22] : memref<9x128x128xf32, #tpu.memory_space<vmem>>, vector<1x128x128xf32>
    %26 = vector.shape_cast %25 : vector<1x128x128xf32> to vector<128x128xf32>
    %cst_23 = arith.constant dense<0.000000e+00> : vector<8x128xf32>
    %27 = tpu.matmul %24, %26, %cst_23 {dimension_numbers = #tpu.dot_dimension_numbers<[1], [0], [0], [1], [0, 0, 1, 1], [], []>} : vector<8x128xf32>, vector<128x128xf32>, vector<8x128xf32> -> vector<8x128xf32>
    %28 = arith.addf %23, %27 : vector<8x128xf32>
    %29 = vector.extract_strided_slice %14 {offsets = [6, 0], sizes = [8, 128], strides = [1, 1]} : vector<24x128xf32> to vector<8x128xf32>
    %c2 = arith.constant 2 : index
    %c0_24 = arith.constant 0 : index
    %c0_25 = arith.constant 0 : index
    %30 = vector.load %arg3[%c2, %c0_24, %c0_25] : memref<9x128x128xf32, #tpu.memory_space<vmem>>, vector<1x128x128xf32>
    %31 = vector.shape_cast %30 : vector<1x128x128xf32> to vector<128x128xf32>
    %cst_26 = arith.constant dense<0.000000e+00> : vector<8x128xf32>
    %32 = tpu.matmul %29, %31, %cst_26 {dimension_numbers = #tpu.dot_dimension_numbers<[1], [0], [0], [1], [0, 0, 1, 1], [], []>} : vector<8x128xf32>, vector<128x128xf32>, vector<8x128xf32> -> vector<8x128xf32>
    %33 = arith.addf %28, %32 : vector<8x128xf32>
    %34 = vector.extract_strided_slice %14 {offsets = [7, 0], sizes = [8, 128], strides = [1, 1]} : vector<24x128xf32> to vector<8x128xf32>
    %c3 = arith.constant 3 : index
    %c0_27 = arith.constant 0 : index
    %c0_28 = arith.constant 0 : index
    %35 = vector.load %arg3[%c3, %c0_27, %c0_28] : memref<9x128x128xf32, #tpu.memory_space<vmem>>, vector<1x128x128xf32>
    %36 = vector.shape_cast %35 : vector<1x128x128xf32> to vector<128x128xf32>
    %cst_29 = arith.constant dense<0.000000e+00> : vector<8x128xf32>
    %37 = tpu.matmul %34, %36, %cst_29 {dimension_numbers = #tpu.dot_dimension_numbers<[1], [0], [0], [1], [0, 0, 1, 1], [], []>} : vector<8x128xf32>, vector<128x128xf32>, vector<8x128xf32> -> vector<8x128xf32>
    %38 = arith.addf %33, %37 : vector<8x128xf32>
    %39 = vector.extract_strided_slice %14 {offsets = [8, 0], sizes = [8, 128], strides = [1, 1]} : vector<24x128xf32> to vector<8x128xf32>
    %c4 = arith.constant 4 : index
    %c0_30 = arith.constant 0 : index
    %c0_31 = arith.constant 0 : index
    %40 = vector.load %arg3[%c4, %c0_30, %c0_31] : memref<9x128x128xf32, #tpu.memory_space<vmem>>, vector<1x128x128xf32>
    %41 = vector.shape_cast %40 : vector<1x128x128xf32> to vector<128x128xf32>
    %cst_32 = arith.constant dense<0.000000e+00> : vector<8x128xf32>
    %42 = tpu.matmul %39, %41, %cst_32 {dimension_numbers = #tpu.dot_dimension_numbers<[1], [0], [0], [1], [0, 0, 1, 1], [], []>} : vector<8x128xf32>, vector<128x128xf32>, vector<8x128xf32> -> vector<8x128xf32>
    %43 = arith.addf %38, %42 : vector<8x128xf32>
    %44 = vector.extract_strided_slice %14 {offsets = [9, 0], sizes = [8, 128], strides = [1, 1]} : vector<24x128xf32> to vector<8x128xf32>
    %c5 = arith.constant 5 : index
    %c0_33 = arith.constant 0 : index
    %c0_34 = arith.constant 0 : index
    %45 = vector.load %arg3[%c5, %c0_33, %c0_34] : memref<9x128x128xf32, #tpu.memory_space<vmem>>, vector<1x128x128xf32>
    %46 = vector.shape_cast %45 : vector<1x128x128xf32> to vector<128x128xf32>
    %cst_35 = arith.constant dense<0.000000e+00> : vector<8x128xf32>
    %47 = tpu.matmul %44, %46, %cst_35 {dimension_numbers = #tpu.dot_dimension_numbers<[1], [0], [0], [1], [0, 0, 1, 1], [], []>} : vector<8x128xf32>, vector<128x128xf32>, vector<8x128xf32> -> vector<8x128xf32>
    %48 = arith.addf %43, %47 : vector<8x128xf32>
    %49 = vector.extract_strided_slice %14 {offsets = [10, 0], sizes = [8, 128], strides = [1, 1]} : vector<24x128xf32> to vector<8x128xf32>
    %c6 = arith.constant 6 : index
    %c0_36 = arith.constant 0 : index
    %c0_37 = arith.constant 0 : index
    %50 = vector.load %arg3[%c6, %c0_36, %c0_37] : memref<9x128x128xf32, #tpu.memory_space<vmem>>, vector<1x128x128xf32>
    %51 = vector.shape_cast %50 : vector<1x128x128xf32> to vector<128x128xf32>
    %cst_38 = arith.constant dense<0.000000e+00> : vector<8x128xf32>
    %52 = tpu.matmul %49, %51, %cst_38 {dimension_numbers = #tpu.dot_dimension_numbers<[1], [0], [0], [1], [0, 0, 1, 1], [], []>} : vector<8x128xf32>, vector<128x128xf32>, vector<8x128xf32> -> vector<8x128xf32>
    %53 = arith.addf %48, %52 : vector<8x128xf32>
    %54 = vector.extract_strided_slice %14 {offsets = [11, 0], sizes = [8, 128], strides = [1, 1]} : vector<24x128xf32> to vector<8x128xf32>
    %c7 = arith.constant 7 : index
    %c0_39 = arith.constant 0 : index
    %c0_40 = arith.constant 0 : index
    %55 = vector.load %arg3[%c7, %c0_39, %c0_40] : memref<9x128x128xf32, #tpu.memory_space<vmem>>, vector<1x128x128xf32>
    %56 = vector.shape_cast %55 : vector<1x128x128xf32> to vector<128x128xf32>
    %cst_41 = arith.constant dense<0.000000e+00> : vector<8x128xf32>
    %57 = tpu.matmul %54, %56, %cst_41 {dimension_numbers = #tpu.dot_dimension_numbers<[1], [0], [0], [1], [0, 0, 1, 1], [], []>} : vector<8x128xf32>, vector<128x128xf32>, vector<8x128xf32> -> vector<8x128xf32>
    %58 = arith.addf %53, %57 : vector<8x128xf32>
    %59 = vector.extract_strided_slice %14 {offsets = [12, 0], sizes = [8, 128], strides = [1, 1]} : vector<24x128xf32> to vector<8x128xf32>
    %c8_42 = arith.constant 8 : index
    %c0_43 = arith.constant 0 : index
    %c0_44 = arith.constant 0 : index
    %60 = vector.load %arg3[%c8_42, %c0_43, %c0_44] : memref<9x128x128xf32, #tpu.memory_space<vmem>>, vector<1x128x128xf32>
    %61 = vector.shape_cast %60 : vector<1x128x128xf32> to vector<128x128xf32>
    %cst_45 = arith.constant dense<0.000000e+00> : vector<8x128xf32>
    %62 = tpu.matmul %59, %61, %cst_45 {dimension_numbers = #tpu.dot_dimension_numbers<[1], [0], [0], [1], [0, 0, 1, 1], [], []>} : vector<8x128xf32>, vector<128x128xf32>, vector<8x128xf32> -> vector<8x128xf32>
    %63 = arith.addf %58, %62 : vector<8x128xf32>
    %cst_46 = arith.constant 0.000000e+00 : f32
    %64 = vector.broadcast %cst_46 : f32 to vector<8x128xf32>
    %65 = arith.maximumf %63, %64 : vector<8x128xf32>
    %c0_47 = arith.constant 0 : index
    %c0_48 = arith.constant 0 : index
    %66 = vector.load %arg5[%c0_47, %c0_48] : memref<16x128xf32, #tpu.memory_space<vmem>>, vector<8x128xf32>
    tpu.vector_store %arg5[%c0_47, %c0_48], %65 {strides = array<i32>} : memref<16x128xf32, #tpu.memory_space<vmem>>, vector<8x128xf32>,
    %c24 = arith.constant 24 : index
    %c0_49 = arith.constant 0 : index
    %67 = vector.load %arg6[%c24, %c0_49] : memref<48x128xf32, #tpu.memory_space<vmem>>, vector<24x128xf32>
    %c0_50 = arith.constant 0 : index
    %c0_51 = arith.constant 0 : index
    %68 = vector.load %arg4[%c0_50, %c0_51] : memref<1x128xf32, #tpu.memory_space<vmem>>, vector<1x128xf32>
    %c8_52 = arith.constant 8 : index
    %c0_53 = arith.constant 0 : index
    %69 = vector.load %arg0[%c8_52, %c0_53] : memref<16x128xf32, #tpu.memory_space<vmem>>, vector<8x128xf32>
    %70 = vector.broadcast %68 : vector<1x128xf32> to vector<8x128xf32>
    %71 = arith.addf %70, %69 : vector<8x128xf32>
    %72 = vector.extract_strided_slice %67 {offsets = [4, 0], sizes = [8, 128], strides = [1, 1]} : vector<24x128xf32> to vector<8x128xf32>
    %c0_54 = arith.constant 0 : index
    %c0_55 = arith.constant 0 : index
    %c0_56 = arith.constant 0 : index
    %73 = vector.load %arg3[%c0_54, %c0_55, %c0_56] : memref<9x128x128xf32, #tpu.memory_space<vmem>>, vector<1x128x128xf32>
    %74 = vector.shape_cast %73 : vector<1x128x128xf32> to vector<128x128xf32>
    %cst_57 = arith.constant dense<0.000000e+00> : vector<8x128xf32>
    %75 = tpu.matmul %72, %74, %cst_57 {dimension_numbers = #tpu.dot_dimension_numbers<[1], [0], [0], [1], [0, 0, 1, 1], [], []>} : vector<8x128xf32>, vector<128x128xf32>, vector<8x128xf32> -> vector<8x128xf32>
    %76 = arith.addf %71, %75 : vector<8x128xf32>
    %77 = vector.extract_strided_slice %67 {offsets = [5, 0], sizes = [8, 128], strides = [1, 1]} : vector<24x128xf32> to vector<8x128xf32>
    %c1_58 = arith.constant 1 : index
    %c0_59 = arith.constant 0 : index
    %c0_60 = arith.constant 0 : index
    %78 = vector.load %arg3[%c1_58, %c0_59, %c0_60] : memref<9x128x128xf32, #tpu.memory_space<vmem>>, vector<1x128x128xf32>
    %79 = vector.shape_cast %78 : vector<1x128x128xf32> to vector<128x128xf32>
    %cst_61 = arith.constant dense<0.000000e+00> : vector<8x128xf32>
    %80 = tpu.matmul %77, %79, %cst_61 {dimension_numbers = #tpu.dot_dimension_numbers<[1], [0], [0], [1], [0, 0, 1, 1], [], []>} : vector<8x128xf32>, vector<128x128xf32>, vector<8x128xf32> -> vector<8x128xf32>
    %81 = arith.addf %76, %80 : vector<8x128xf32>
    %82 = vector.extract_strided_slice %67 {offsets = [6, 0], sizes = [8, 128], strides = [1, 1]} : vector<24x128xf32> to vector<8x128xf32>
    %c2_62 = arith.constant 2 : index
    %c0_63 = arith.constant 0 : index
    %c0_64 = arith.constant 0 : index
    %83 = vector.load %arg3[%c2_62, %c0_63, %c0_64] : memref<9x128x128xf32, #tpu.memory_space<vmem>>, vector<1x128x128xf32>
    %84 = vector.shape_cast %83 : vector<1x128x128xf32> to vector<128x128xf32>
    %cst_65 = arith.constant dense<0.000000e+00> : vector<8x128xf32>
    %85 = tpu.matmul %82, %84, %cst_65 {dimension_numbers = #tpu.dot_dimension_numbers<[1], [0], [0], [1], [0, 0, 1, 1], [], []>} : vector<8x128xf32>, vector<128x128xf32>, vector<8x128xf32> -> vector<8x128xf32>
    %86 = arith.addf %81, %85 : vector<8x128xf32>
    %87 = vector.extract_strided_slice %67 {offsets = [7, 0], sizes = [8, 128], strides = [1, 1]} : vector<24x128xf32> to vector<8x128xf32>
    %c3_66 = arith.constant 3 : index
    %c0_67 = arith.constant 0 : index
    %c0_68 = arith.constant 0 : index
    %88 = vector.load %arg3[%c3_66, %c0_67, %c0_68] : memref<9x128x128xf32, #tpu.memory_space<vmem>>, vector<1x128x128xf32>
    %89 = vector.shape_cast %88 : vector<1x128x128xf32> to vector<128x128xf32>
    %cst_69 = arith.constant dense<0.000000e+00> : vector<8x128xf32>
    %90 = tpu.matmul %87, %89, %cst_69 {dimension_numbers = #tpu.dot_dimension_numbers<[1], [0], [0], [1], [0, 0, 1, 1], [], []>} : vector<8x128xf32>, vector<128x128xf32>, vector<8x128xf32> -> vector<8x128xf32>
    %91 = arith.addf %86, %90 : vector<8x128xf32>
    %92 = vector.extract_strided_slice %67 {offsets = [8, 0], sizes = [8, 128], strides = [1, 1]} : vector<24x128xf32> to vector<8x128xf32>
    %c4_70 = arith.constant 4 : index
    %c0_71 = arith.constant 0 : index
    %c0_72 = arith.constant 0 : index
    %93 = vector.load %arg3[%c4_70, %c0_71, %c0_72] : memref<9x128x128xf32, #tpu.memory_space<vmem>>, vector<1x128x128xf32>
    %94 = vector.shape_cast %93 : vector<1x128x128xf32> to vector<128x128xf32>
    %cst_73 = arith.constant dense<0.000000e+00> : vector<8x128xf32>
    %95 = tpu.matmul %92, %94, %cst_73 {dimension_numbers = #tpu.dot_dimension_numbers<[1], [0], [0], [1], [0, 0, 1, 1], [], []>} : vector<8x128xf32>, vector<128x128xf32>, vector<8x128xf32> -> vector<8x128xf32>
    %96 = arith.addf %91, %95 : vector<8x128xf32>
    %97 = vector.extract_strided_slice %67 {offsets = [9, 0], sizes = [8, 128], strides = [1, 1]} : vector<24x128xf32> to vector<8x128xf32>
    %c5_74 = arith.constant 5 : index
    %c0_75 = arith.constant 0 : index
    %c0_76 = arith.constant 0 : index
    %98 = vector.load %arg3[%c5_74, %c0_75, %c0_76] : memref<9x128x128xf32, #tpu.memory_space<vmem>>, vector<1x128x128xf32>
    %99 = vector.shape_cast %98 : vector<1x128x128xf32> to vector<128x128xf32>
    %cst_77 = arith.constant dense<0.000000e+00> : vector<8x128xf32>
    %100 = tpu.matmul %97, %99, %cst_77 {dimension_numbers = #tpu.dot_dimension_numbers<[1], [0], [0], [1], [0, 0, 1, 1], [], []>} : vector<8x128xf32>, vector<128x128xf32>, vector<8x128xf32> -> vector<8x128xf32>
    %101 = arith.addf %96, %100 : vector<8x128xf32>
    %102 = vector.extract_strided_slice %67 {offsets = [10, 0], sizes = [8, 128], strides = [1, 1]} : vector<24x128xf32> to vector<8x128xf32>
    %c6_78 = arith.constant 6 : index
    %c0_79 = arith.constant 0 : index
    %c0_80 = arith.constant 0 : index
    %103 = vector.load %arg3[%c6_78, %c0_79, %c0_80] : memref<9x128x128xf32, #tpu.memory_space<vmem>>, vector<1x128x128xf32>
    %104 = vector.shape_cast %103 : vector<1x128x128xf32> to vector<128x128xf32>
    %cst_81 = arith.constant dense<0.000000e+00> : vector<8x128xf32>
    %105 = tpu.matmul %102, %104, %cst_81 {dimension_numbers = #tpu.dot_dimension_numbers<[1], [0], [0], [1], [0, 0, 1, 1], [], []>} : vector<8x128xf32>, vector<128x128xf32>, vector<8x128xf32> -> vector<8x128xf32>
    %106 = arith.addf %101, %105 : vector<8x128xf32>
    %107 = vector.extract_strided_slice %67 {offsets = [11, 0], sizes = [8, 128], strides = [1, 1]} : vector<24x128xf32> to vector<8x128xf32>
    %c7_82 = arith.constant 7 : index
    %c0_83 = arith.constant 0 : index
    %c0_84 = arith.constant 0 : index
    %108 = vector.load %arg3[%c7_82, %c0_83, %c0_84] : memref<9x128x128xf32, #tpu.memory_space<vmem>>, vector<1x128x128xf32>
    %109 = vector.shape_cast %108 : vector<1x128x128xf32> to vector<128x128xf32>
    %cst_85 = arith.constant dense<0.000000e+00> : vector<8x128xf32>
    %110 = tpu.matmul %107, %109, %cst_85 {dimension_numbers = #tpu.dot_dimension_numbers<[1], [0], [0], [1], [0, 0, 1, 1], [], []>} : vector<8x128xf32>, vector<128x128xf32>, vector<8x128xf32> -> vector<8x128xf32>
    %111 = arith.addf %106, %110 : vector<8x128xf32>
    %112 = vector.extract_strided_slice %67 {offsets = [12, 0], sizes = [8, 128], strides = [1, 1]} : vector<24x128xf32> to vector<8x128xf32>
    %c8_86 = arith.constant 8 : index
    %c0_87 = arith.constant 0 : index
    %c0_88 = arith.constant 0 : index
    %113 = vector.load %arg3[%c8_86, %c0_87, %c0_88] : memref<9x128x128xf32, #tpu.memory_space<vmem>>, vector<1x128x128xf32>
    %114 = vector.shape_cast %113 : vector<1x128x128xf32> to vector<128x128xf32>
    %cst_89 = arith.constant dense<0.000000e+00> : vector<8x128xf32>
    %115 = tpu.matmul %112, %114, %cst_89 {dimension_numbers = #tpu.dot_dimension_numbers<[1], [0], [0], [1], [0, 0, 1, 1], [], []>} : vector<8x128xf32>, vector<128x128xf32>, vector<8x128xf32> -> vector<8x128xf32>
    %116 = arith.addf %111, %115 : vector<8x128xf32>
    %cst_90 = arith.constant 0.000000e+00 : f32
    %117 = vector.broadcast %cst_90 : f32 to vector<8x128xf32>
    %118 = arith.maximumf %116, %117 : vector<8x128xf32>
    %c8_91 = arith.constant 8 : index
    %c0_92 = arith.constant 0 : index
    %119 = vector.load %arg5[%c8_91, %c0_92] : memref<16x128xf32, #tpu.memory_space<vmem>>, vector<8x128xf32>
    tpu.vector_store %arg5[%c8_91, %c0_92], %118 {strides = array<i32>} : memref<16x128xf32, #tpu.memory_space<vmem>>, vector<8x128xf32>,
    return
  }
}

</mosaic_0001>

<bundles_post_ra>
// kernel: stgcn_block_forward.1
= control target key start
LH: loop header
LB: loop body
LE: loop exit
PB: predicated region body
PF: predicated region fallthrough
CT: control target
= control target key end

     0   :  { %v3560_v3 = vmov 0.0|0.0   ;;  %vm3561_vm0 = vmmov 0   ;;  %v3562_v51 = vmov 0.0   ;;  %vm160_vm1 = vcmask 1043456   ;;  %s4314_s1 = inlined_call_operand.vmem [shape: f32[128,128], index: 1, kind: input, shape index: {}]   ;;  %s4315_s0 = inlined_call_operand.vmem [shape: f32[16,128], index: 0, kind: input, shape index: {}]   ;;  %s4316_s3 = inlined_call_operand.vmem [shape: f32[9,128,128], index: 3, kind: input, shape index: {}]   ;;  %s4317_s2 = inlined_call_operand.vmem [shape: f32[1,128], index: 2, kind: input, shape index: {}]   ;;  %s4318_s4 = inlined_call_operand.vmem [shape: f32[1,128], index: 4, kind: input, shape index: {}]   ;;  %s4319_s5 = inlined_call_operand.vmem [shape: f32[16,128], index: 5, kind: output, shape index: {}]  }
   0x1   :  { %v22_v0 = vld [vmem:[%s4314_s1] sm:$0xff]  ;;  %v23_v1 = vld [vmem:[%s4314_s1 + $0x8] sm:$0xff]  ;;  %v24_v2 = vld [vmem:[%s4314_s1 + $0x10] sm:$0xff]  ;;  %3091 = vmatprep.subr.bf16.mxu1 %v3560_v3  ;;  %2461 = vmatprep.mubr.msk.f32.mxu1 %vm3561_vm0, %v3562_v51  ;;  %v161_v60 = vrot.slane %v3562_v51, 4  ;;  %vm253_vm2 = vcmask 1042432   ;;  %vm346_vm3 = vcmask 1041408  }
   0x2   :  { %v3059_v4 = vpack.c.bf16 %v23_v1, %v22_v0  ;;  %v25_v5 = vld [vmem:[%s4314_s1 + $0x18] sm:$0xff]  ;;  %v26_v7 = vld [vmem:[%s4314_s1 + $0x20] sm:$0xff]  ;;  %v27_v8 = vld [vmem:[%s4314_s1 + $0x28] sm:$0xff]  ;;  %vm439_vm4 = vcmask 1040384   ;;  %vm621_vm5 = vcmask 1046528   ;;  %vm714_vm6 = vcmask 1045504  }
   0x3   :  { %v3063_v6 = vpack.c.bf16 %v25_v5, %v24_v2  ;;  %v3067_v9 = vpack.c.bf16 %v27_v8, %v26_v7  ;;  %v28_v10 = vld [vmem:[%s4314_s1 + $0x30] sm:$0xff]  ;;  %v29_v11 = vld [vmem:[%s4314_s1 + $0x38] sm:$0xff]  ;;  %v20_v12 = vld [vmem:[%s4315_s0] sm:$0xff]  ;;  %vm807_vm7 = vcmask 1044480  }
   0x4   :  { %3060 = vmatprep.subr.bf16.mxu0 %v3059_v4  ;;  %2426 = vmatprep.mubr.f32.mxu0 %v20_v12  ;;  %v988_v13 = vld [vmem:[%s4316_s3] sm:$0xff]  ;;  %v989_v14 = vld [vmem:[%s4316_s3 + $0x8] sm:$0xff]  ;;  %v990_v15 = vld [vmem:[%s4316_s3 + $0x10] sm:$0xff]  ;;  %v3071_v18 = vpack.c.bf16 %v29_v11, %v28_v10 }
   0x5   :  { %3062 = vmatpush3.bf16.msra.mxu0 %v3059_v4  ;;  %v3308_v16 = vpack.c.bf16 %v989_v14, %v988_v13  ;;  %v991_v17 = vld [vmem:[%s4316_s3 + $0x18] sm:$0xff]  ;;  %v30_v19 = vld [vmem:[%s4314_s1 + $0x40] sm:$0xff]  ;;  %v31_v21 = vld [vmem:[%s4314_s1 + $0x48] sm:$0xff] }
   0x6   :  { %3064 = vmatprep.subr.bf16.mxu0 %v3063_v6  ;;  %v3311_v20 = vpack.c.bf16 %v991_v17, %v990_v15  ;;  %v992_v22 = vld [vmem:[%s4316_s3 + $0x20] sm:$0xff]  ;;  %v993_v23 = vld [vmem:[%s4316_s3 + $0x28] sm:$0xff]  ;;  %v3075_v24 = vpack.c.bf16 %v31_v21, %v30_v19  ;;  %v32_v25 = vld [vmem:[%s4314_s1 + $0x50] sm:$0xff] }
   0x7   :  { %3093 = vmatpush3.bf16.msra.mxu1 %v3308_v16  ;;  %v3314_v26 = vpack.c.bf16 %v993_v23, %v992_v22  ;;  %v33_v27 = vld [vmem:[%s4314_s1 + $0x58] sm:$0xff]  ;;  %v994_v28 = vld [vmem:[%s4316_s3 + $0x30] sm:$0xff]  ;;  %v34_v31 = vld [vmem:[%s4314_s1 + $0x60] sm:$0xff] }
   0x8   :  { %3094 = vmatprep.subr.bf16.mxu1 %v3560_v3  ;;  %v995_v29 = vld [vmem:[%s4316_s3 + $0x38] sm:$0xff]  ;;  %v3079_v30 = vpack.c.bf16 %v33_v27, %v32_v25  ;;  %v35_v33 = vld [vmem:[%s4314_s1 + $0x68] sm:$0xff]  ;;  %v996_v34 = vld [vmem:[%s4316_s3 + $0x40] sm:$0xff] }
   0x9   :  { %3066 = vmatpush3.bf16.msra.mxu0 %v3063_v6  ;;  %v3317_v32 = vpack.c.bf16 %v995_v29, %v994_v28  ;;  %v997_v35 = vld [vmem:[%s4316_s3 + $0x48] sm:$0xff]  ;;  %v3083_v36 = vpack.c.bf16 %v35_v33, %v34_v31  ;;  %v36_v37 = vld [vmem:[%s4314_s1 + $0x70] sm:$0xff]  ;;  %v37_v39 = vld [vmem:[%s4314_s1 + $0x78] sm:$0xff]  ;;  %v254_v29 = vrot.slane %v3562_v51, 5 }
   0xa   :  { %3068 = vmatprep.subr.bf16.mxu0 %v3067_v9  ;;  %v3320_v38 = vpack.c.bf16 %v997_v35, %v996_v34  ;;  %v998_v40 = vld [vmem:[%s4316_s3 + $0x50] sm:$0xff]  ;;  %v999_v41 = vld [vmem:[%s4316_s3 + $0x58] sm:$0xff]  ;;  %v3087_v42 = vpack.c.bf16 %v37_v39, %v36_v37  ;;  %v21_v44 = vld [vmem:[%s4315_s0 + $0x8] sm:$0xff] }
   0xb   :  { %3096 = vmatpush3.bf16.msra.mxu1 %v3311_v20  ;;  %v3323_v43 = vpack.c.bf16 %v999_v41, %v998_v40  ;;  %v1000_v45 = vld [vmem:[%s4316_s3 + $0x60] sm:$0xff]  ;;  %v1001_v46 = vld [vmem:[%s4316_s3 + $0x68] sm:$0xff]  ;;  %v1002_v48 = vld [vmem:[%s4316_s3 + $0x70] sm:$0xff] }
   0xc   :  { %3097 = vmatprep.subr.bf16.mxu1 %v3560_v3  ;;  %v3326_v47 = vpack.c.bf16 %v1001_v46, %v1000_v45  ;;  %v1003_v49 = vld [vmem:[%s4316_s3 + $0x78] sm:$0xff]  ;;  %v1811_v52 = vld [vmem:[%s4317_s2] ss:$0 sm:$0xff]  ;;  %v1943_v58 = vld [vmem:[%s4316_s3 + $0x88] sm:$0xff] }
   0xd   :  { %3070 = vmatpush3.bf16.msra.mxu0 %v3067_v9  ;;  %v3329_v50 = vpack.c.bf16 %v1003_v49, %v1002_v48  ;;  %v1942_v57 = vld [vmem:[%s4316_s3 + $0x80] sm:$0xff]  ;;  %v1944_v1 = vld [vmem:[%s4316_s3 + $0x90] sm:$0xff]  ;;  %v1945_v2 = vld [vmem:[%s4316_s3 + $0x98] sm:$0xff] }
   0xe   :  { %3072 = vmatprep.subr.bf16.mxu0 %v3071_v18  ;;  %v3332_v63 = vpack.c.bf16 %v1943_v58, %v1942_v57  ;;  %v3335_v6 = vpack.c.bf16 %v1945_v2, %v1944_v1  ;;  %v1946_v7 = vld [vmem:[%s4316_s3 + $0xa0] sm:$0xff]  ;;  %v1947_v8 = vld [vmem:[%s4316_s3 + $0xa8] sm:$0xff]  ;;  %v1948_v12 = vld [vmem:[%s4316_s3 + $0xb0] sm:$0xff] }
   0xf   :  { %3099 = vmatpush3.bf16.msra.mxu1 %v3314_v26  ;;  %v3338_v10 = vpack.c.bf16 %v1947_v8, %v1946_v7  ;;  %v1949_v13 = vld [vmem:[%s4316_s3 + $0xb8] sm:$0xff]  ;;  %v1950_v15 = vld [vmem:[%s4316_s3 + $0xc0] sm:$0xff]  ;;  %v1955_v22 = vld [vmem:[%s4316_s3 + $0xe8] sm:$0xff] }
  0x10   :  { %3100 = vmatprep.subr.bf16.mxu1 %v3560_v3  ;;  %v3341_v14 = vpack.c.bf16 %v1949_v13, %v1948_v12  ;;  %v1953_v19 = vld [vmem:[%s4316_s3 + $0xd8] sm:$0xff]  ;;  %v1954_v21 = vld [vmem:[%s4316_s3 + $0xe0] sm:$0xff]  ;;  %v1959_v28 = vld [vmem:[%s4316_s3 + $0x108] sm:$0xff] }
  0x11   :  { %3074 = vmatpush3.bf16.msra.mxu0 %v3071_v18  ;;  %v1952_v18 = vld [vmem:[%s4316_s3 + $0xd0] sm:$0xff]  ;;  %v3350_v23 = vpack.c.bf16 %v1955_v22, %v1954_v21  ;;  %v1957_v25 = vld [vmem:[%s4316_s3 + $0xf8] sm:$0xff]  ;;  %v1958_v27 = vld [vmem:[%s4316_s3 + $0x100] sm:$0xff] }
  0x12   :  { %3076 = vmatprep.subr.bf16.mxu0 %v3075_v24  ;;  %v1960_v33 = vld [vmem:[%s4316_s3 + $0x110] sm:$0xff]  ;;  %v1961_v34 = vld [vmem:[%s4316_s3 + $0x118] sm:$0xff]  ;;  %v1963_v39 = vld [vmem:[%s4316_s3 + $0x128] sm:$0xff] }
  0x13   :  { %3102 = vmatpush3.bf16.msra.mxu1 %v3317_v32  ;;  %v3359_v37 = vpack.c.bf16 %v1961_v34, %v1960_v33  ;;  %v1964_v41 = vld [vmem:[%s4316_s3 + $0x130] sm:$0xff]  ;;  %v1967_v45 = vld [vmem:[%s4316_s3 + $0x148] sm:$0xff]  ;;  %v1969_v48 = vld [vmem:[%s4316_s3 + $0x158] sm:$0xff] }
  0x14   :  { %3103 = vmatprep.subr.bf16.mxu1 %v3560_v3  ;;  %v1974_v57 = vld [vmem:[%s4316_s3 + $0x180] sm:$0xff]  ;;  %v1975_v58 = vld [vmem:[%s4316_s3 + $0x188] sm:$0xff]  ;;  %v1976_v1 = vld [vmem:[%s4316_s3 + $0x190] sm:$0xff] }
  0x15   :  { %3078 = vmatpush3.bf16.msra.mxu0 %v3075_v24  ;;  %v1956_v24 = vld [vmem:[%s4316_s3 + $0xf0] sm:$0xff]  ;;  %v1977_v2 = vld [vmem:[%s4316_s3 + $0x198] sm:$0xff]  ;;  %v1978_v7 = vld [vmem:[%s4316_s3 + $0x1a0] sm:$0xff] }
  0x16   :  { %3080 = vmatprep.subr.bf16.mxu0 %v3079_v30  ;;  %v1979_v8 = vld [vmem:[%s4316_s3 + $0x1a8] sm:$0xff]  ;;  %v1980_v12 = vld [vmem:[%s4316_s3 + $0x1b0] sm:$0xff]  ;;  %v1981_v13 = vld [vmem:[%s4316_s3 + $0x1b8] sm:$0xff] }
  0x17   :  { %3105 = vmatpush3.bf16.msra.mxu1 %v3320_v38  ;;  %v1986_v21 = vld [vmem:[%s4316_s3 + $0x1e0] sm:$0xff]  ;;  %v1987_v22 = vld [vmem:[%s4316_s3 + $0x1e8] sm:$0xff]  ;;  %v1992_v33 = vld [vmem:[%s4316_s3 + $0x210] sm:$0xff] }
  0x18   :  { %3106 = vmatprep.subr.bf16.mxu1 %v3560_v3  ;;  %v1993_v34 = vld [vmem:[%s4316_s3 + $0x218] sm:$0xff] }
  0x19   :  { %3082 = vmatpush3.bf16.msra.mxu0 %v3079_v30 }
  0x1a   :  { %3084 = vmatprep.subr.bf16.mxu0 %v3083_v36 }
  0x1b   :  { %3108 = vmatpush3.bf16.msra.mxu1 %v3323_v43 }
  0x1c   :  { %3109 = vmatprep.subr.bf16.mxu1 %v3560_v3 }
  0x1d   :  { %3086 = vmatpush3.bf16.msra.mxu0 %v3083_v36 }
  0x1e   :  { %3088 = vmatprep.subr.bf16.mxu0 %v3087_v42 }
  0x1f   :  { %3111 = vmatpush3.bf16.msra.mxu1 %v3326_v47 }
  0x20   :  { %3112 = vmatprep.subr.bf16.mxu1 %v3560_v3 }
  0x21   :  { %3090 = vmatpush3.bf16.msra.mxu0 %v3087_v42  ;;  %v1965_v42 = vld [vmem:[%s4316_s3 + $0x138] sm:$0xff] }
  0x22   :  { %3307 = vmatprep.subr.bf16.mxu0 %v3560_v3 }
  0x23   :  { %3114 = vmatpush3.bf16.msra.mxu1 %v3329_v50 }
  0x24   :  { %2427 = vmatmul.mubr.f32.vlgmr.msra.gmra.mrb[0].mxu0 %v21_v44  ;;  %3115 = vmatprep.subr.bf16.mxu1 %v3560_v3  ;;  %v1966_v44 = vld [vmem:[%s4316_s3 + $0x140] sm:$0xff] }
  0x25   :  { %3309 = vmatpush3.bf16.msra.mxu0 %v3308_v16  ;;  %2776 = vmatprep.mubr.msk.f32.mxu0 %vm3561_vm0, %v3562_v51  ;;  %v1951_v16 = vld [vmem:[%s4316_s3 + $0xc8] sm:$0xff]  ;;  %v3368_v46 = vpack.c.bf16 %v1967_v45, %v1966_v44  ;;  %v1998_v44 = vld [vmem:[%s4316_s3 + $0x240] sm:$0xff] }
  0x26   :  { %3310 = vmatprep.subr.bf16.mxu0 %v3560_v3  ;;  %v3344_v17 = vpack.c.bf16 %v1951_v16, %v1950_v15  ;;  %v1982_v15 = vld [vmem:[%s4316_s3 + $0x1c0] sm:$0xff]  ;;  %v1983_v16 = vld [vmem:[%s4316_s3 + $0x1c8] sm:$0xff] }
  0x27   :  { %v1999_v45 = vld [vmem:[%s4316_s3 + $0x248] sm:$0xff] }
  0x29   :  { %3312 = vmatpush3.bf16.msra.mxu0 %v3311_v20  ;;  %v3347_v20 = vpack.c.bf16 %v1953_v19, %v1952_v18  ;;  %v1984_v18 = vld [vmem:[%s4316_s3 + $0x1d0] sm:$0xff]  ;;  %v1985_v19 = vld [vmem:[%s4316_s3 + $0x1d8] sm:$0xff] }
  0x2a   :  { %3313 = vmatprep.subr.bf16.mxu0 %v3560_v3 }
  0x2d   :  { %3315 = vmatpush3.bf16.msra.mxu0 %v3314_v26  ;;  %v3353_v26 = vpack.c.bf16 %v1957_v25, %v1956_v24  ;;  %v1988_v24 = vld [vmem:[%s4316_s3 + $0x1f0] sm:$0xff]  ;;  %v1989_v25 = vld [vmem:[%s4316_s3 + $0x1f8] sm:$0xff] }
  0x2e   :  { %3316 = vmatprep.subr.bf16.mxu0 %v3560_v3 }
  0x31   :  { %3318 = vmatpush3.bf16.msra.mxu0 %v3317_v32  ;;  %v3356_v32 = vpack.c.bf16 %v1959_v28, %v1958_v27  ;;  %v1990_v27 = vld [vmem:[%s4316_s3 + $0x200] sm:$0xff]  ;;  %v1991_v28 = vld [vmem:[%s4316_s3 + $0x208] sm:$0xff] }
  0x32   :  { %3319 = vmatprep.subr.bf16.mxu0 %v3560_v3 }
  0x35   :  { %3321 = vmatpush3.bf16.msra.mxu0 %v3320_v38  ;;  %v1962_v38 = vld [vmem:[%s4316_s3 + $0x120] sm:$0xff] }
  0x36   :  { %3322 = vmatprep.subr.bf16.mxu0 %v3560_v3  ;;  %v3362_v40 = vpack.c.bf16 %v1963_v39, %v1962_v38  ;;  %v1994_v38 = vld [vmem:[%s4316_s3 + $0x220] sm:$0xff]  ;;  %v1995_v39 = vld [vmem:[%s4316_s3 + $0x228] sm:$0xff] }
  0x39   :  { %3324 = vmatpush3.bf16.msra.mxu0 %v3323_v43  ;;  %v3365_v43 = vpack.c.bf16 %v1965_v42, %v1964_v41  ;;  %v1996_v41 = vld [vmem:[%s4316_s3 + $0x230] sm:$0xff]  ;;  %v1997_v42 = vld [vmem:[%s4316_s3 + $0x238] sm:$0xff] }
  0x3a   :  { %3325 = vmatprep.subr.bf16.mxu0 %v3560_v3 }
  0x3d   :  { %3327 = vmatpush3.bf16.msra.mxu0 %v3326_v47  ;;  %v1968_v47 = vld [vmem:[%s4316_s3 + $0x150] sm:$0xff] }
  0x3e   :  { %3328 = vmatprep.subr.bf16.mxu0 %v3560_v3  ;;  %v3371_v49 = vpack.c.bf16 %v1969_v48, %v1968_v47  ;;  %v2000_v47 = vld [vmem:[%s4316_s3 + $0x250] sm:$0xff]  ;;  %v2001_v48 = vld [vmem:[%s4316_s3 + $0x258] sm:$0xff] }
  0x41   :  { %3330 = vmatpush3.bf16.msra.mxu0 %v3329_v50  ;;  %v1970_v50 = vld [vmem:[%s4316_s3 + $0x160] sm:$0xff] }
  0x42   :  { %3331 = vmatprep.subr.bf16.mxu0 %v3560_v3 }
  0xf7   :  { %v2428_v53 = vpop.f32.mrb[0].mxu0 }
  0xf8   :  { %v117_v54 = vadd.f32 %v2428_v53, %v1811_v52  ;;  %v111_v55 = vpop.f32.mrb[1].mxu0 }
  0xf9   :  { %v112_v56 = vadd.f32 %v1811_v52, %v111_v55  ;;  %v1971_v52 = vld [vmem:[%s4316_s3 + $0x168] sm:$0xff]  ;;  %v1973_v55 = vld [vmem:[%s4316_s3 + $0x178] sm:$0xff] }
  0xfa   :  { %v3726_v59 = vmax.f32 %v117_v54, 0.0  ;;  %v3374_v53 = vpack.c.bf16 %v1971_v52, %v1970_v50  ;;  %v1972_v54 = vld [vmem:[%s4316_s3 + $0x170] sm:$0xff]  ;;  %v2002_v50 = vld [vmem:[%s4316_s3 + $0x260] sm:$0xff]  ;;  %v2003_v52 = vld [vmem:[%s4316_s3 + $0x268] sm:$0xff] }
  0xfb   :  { %v3729_v61 = vmax.f32 %v112_v56, 0.0  ;;  %v3377_v56 = vpack.c.bf16 %v1973_v55, %v1972_v54  ;;  %v2004_v54 = vld [vmem:[%s4316_s3 + $0x270] sm:$0xff]  ;;  %v2005_v55 = vld [vmem:[%s4316_s3 + $0x278] sm:$0xff] }
  0xfc   :  { %v1007_v62 = vrot.slane %v3726_v59, 4  ;;  %v1098_v30 = vrot.slane %v3726_v59, 5 }
  0xfd   :  { %v162_v0 = vrot.slane %v3729_v61, 4  ;;  %v255_v31 = vrot.slane %v3729_v61, 5 }
  0xfe   :  { %v1008_v4 = vsel %vm160_vm1, %v161_v60, %v1007_v62  ;;  %v3749_v9 = vsel %vm160_vm1, %v1007_v62, %v161_v60  ;;  %v1099_v35 = vsel %vm253_vm2, %v254_v29, %v1098_v30  ;;  %v1189_v62 = vrot.slane %v3726_v59, 6 }
  0xff   :  { %2777 = vmatmul.mubr.f32.vlgmr.msra.gmra.mrb[2].mxu0 %v1008_v4  ;;  %v163_v5 = vsel %vm160_vm1, %v161_v60, %v162_v0  ;;  %v3757_v11 = vsel %vm160_vm1, %v162_v0, %v161_v60  ;;  %v256_v36 = vsel %vm253_vm2, %v254_v29, %v255_v31  ;;  %v347_v60 = vrot.slane %v3562_v51, 6 }
 0x100   :  { %3333 = vmatpush3.bf16.msra.mxu0 %v3332_v63  ;;  %2462 = vmatmul.mubr.f32.vlgmr.msra.gmra.mrb[0].mxu1 %v163_v5  ;;  %v3380_v0 = vpack.c.bf16 %v1975_v58, %v1974_v57  ;;  %v440_v29 = vrot.slane %v3562_v51, 7  ;;  %v1280_v30 = vrot.slane %v3726_v59, 7  ;;  %v441_v31 = vrot.slane %v3729_v61, 7  ;;  %v2006_v57 = vld [vmem:[%s4316_s3 + $0x280] sm:$0xff]  ;;  %v2007_v58 = vld [vmem:[%s4316_s3 + $0x288] sm:$0xff] }
 0x101   :  { %3117 = vmatpush3.bf16.msra.mxu1 %v3332_v63  ;;  %3334 = vmatprep.subr.bf16.mxu0 %v3560_v3  ;;  %v348_v63 = vrot.slane %v3729_v61, 6  ;;  %v1190_v4 = vsel %vm346_vm3, %v347_v60, %v1189_v62  ;;  %v2008_v62 = vld [vmem:[%s4316_s3 + $0x290] sm:$0xff] }
 0x102   :  { %3118 = vmatprep.subr.bf16.mxu1 %v3560_v3  ;;  %2811 = vmatprep.mubr.msk.f32.mxu0 %vm3561_vm0, %v3562_v51 }
 0x103   :  { %2496 = vmatprep.mubr.msk.f32.mxu1 %vm3561_vm0, %v3562_v51  ;;  %v349_v5 = vsel %vm346_vm3, %v347_v60, %v348_v63  ;;  %v3428_v60 = vpack.c.bf16 %v2007_v58, %v2006_v57  ;;  %v2009_v63 = vld [vmem:[%s4316_s3 + $0x298] sm:$0xff]  ;;  %v2040_v58 = vld [vmem:[%s4316_s3 + $0x390] sm:$0xff] }
 0x104   :  { %3336 = vmatpush3.bf16.msra.mxu0 %v3335_v6 }
 0x105   :  { %3120 = vmatpush3.bf16.msra.mxu1 %v3335_v6  ;;  %3337 = vmatprep.subr.bf16.mxu0 %v3560_v3  ;;  %v3383_v6 = vpack.c.bf16 %v1977_v2, %v1976_v1  ;;  %v2010_v1 = vld [vmem:[%s4316_s3 + $0x2a0] sm:$0xff]  ;;  %v2011_v2 = vld [vmem:[%s4316_s3 + $0x2a8] sm:$0xff] }
 0x106   :  { %3121 = vmatprep.subr.bf16.mxu1 %v3560_v3 }
 0x108   :  { %3339 = vmatpush3.bf16.msra.mxu0 %v3338_v10 }
 0x109   :  { %3123 = vmatpush3.bf16.msra.mxu1 %v3338_v10  ;;  %3340 = vmatprep.subr.bf16.mxu0 %v3560_v3  ;;  %v3386_v10 = vpack.c.bf16 %v1979_v8, %v1978_v7  ;;  %v2014_v8 = vld [vmem:[%s4316_s3 + $0x2c0] sm:$0xff] }
 0x10a   :  { %3124 = vmatprep.subr.bf16.mxu1 %v3560_v3 }
 0x10c   :  { %3342 = vmatpush3.bf16.msra.mxu0 %v3341_v14 }
 0x10d   :  { %3126 = vmatpush3.bf16.msra.mxu1 %v3341_v14  ;;  %3343 = vmatprep.subr.bf16.mxu0 %v3560_v3  ;;  %v3389_v14 = vpack.c.bf16 %v1981_v13, %v1980_v12  ;;  %v2016_v13 = vld [vmem:[%s4316_s3 + $0x2d0] sm:$0xff] }
 0x10e   :  { %3127 = vmatprep.subr.bf16.mxu1 %v3560_v3 }
 0x110   :  { %3345 = vmatpush3.bf16.msra.mxu0 %v3344_v17 }
 0x111   :  { %3129 = vmatpush3.bf16.msra.mxu1 %v3344_v17  ;;  %3346 = vmatprep.subr.bf16.mxu0 %v3560_v3  ;;  %v3392_v17 = vpack.c.bf16 %v1983_v16, %v1982_v15  ;;  %v2018_v16 = vld [vmem:[%s4316_s3 + $0x2e0] sm:$0xff] }
 0x112   :  { %3130 = vmatprep.subr.bf16.mxu1 %v3560_v3 }
 0x114   :  { %3348 = vmatpush3.bf16.msra.mxu0 %v3347_v20 }
 0x115   :  { %3132 = vmatpush3.bf16.msra.mxu1 %v3347_v20  ;;  %3349 = vmatprep.subr.bf16.mxu0 %v3560_v3  ;;  %v3395_v20 = vpack.c.bf16 %v1985_v19, %v1984_v18  ;;  %v2020_v19 = vld [vmem:[%s4316_s3 + $0x2f0] sm:$0xff] }
 0x116   :  { %3133 = vmatprep.subr.bf16.mxu1 %v3560_v3 }
 0x118   :  { %3351 = vmatpush3.bf16.msra.mxu0 %v3350_v23 }
 0x119   :  { %3135 = vmatpush3.bf16.msra.mxu1 %v3350_v23  ;;  %3352 = vmatprep.subr.bf16.mxu0 %v3560_v3  ;;  %v3398_v23 = vpack.c.bf16 %v1987_v22, %v1986_v21  ;;  %v2022_v22 = vld [vmem:[%s4316_s3 + $0x300] sm:$0xff] }
 0x11a   :  { %3136 = vmatprep.subr.bf16.mxu1 %v3560_v3 }
 0x11c   :  { %3354 = vmatpush3.bf16.msra.mxu0 %v3353_v26 }
 0x11d   :  { %3138 = vmatpush3.bf16.msra.mxu1 %v3353_v26  ;;  %3355 = vmatprep.subr.bf16.mxu0 %v3560_v3  ;;  %v3401_v26 = vpack.c.bf16 %v1989_v25, %v1988_v24  ;;  %v623_v24 = vrot.slane %v3562_v51, 1  ;;  %v1458_v25 = vrot.slane %v3726_v59, 1 }
 0x11e   :  { %3139 = vmatprep.subr.bf16.mxu1 %v3560_v3 }
 0x11f   :  { %2812 = vmatmul.mubr.f32.vlgmr.msra.gmra.mrb[2].mxu0 %v1099_v35  ;;  %v1281_v35 = vsel %vm439_vm4, %v440_v29, %v1280_v30  ;;  %v1460_v30 = vsel %vm621_vm5, %v1458_v25, %v623_v24  ;;  %v1640_v25 = vrot.slane %v3726_v59, 3 }
 0x120   :  { %2497 = vmatmul.mubr.f32.vlgmr.msra.gmra.mrb[0].mxu1 %v256_v36  ;;  %3357 = vmatpush3.bf16.msra.mxu0 %v3356_v32  ;;  %v442_v36 = vsel %vm439_vm4, %v440_v29, %v441_v31  ;;  %v2025_v29 = vld [vmem:[%s4316_s3 + $0x318] sm:$0xff] }
 0x121   :  { %3141 = vmatpush3.bf16.msra.mxu1 %v3356_v32  ;;  %3358 = vmatprep.subr.bf16.mxu0 %v3560_v3  ;;  %v3404_v32 = vpack.c.bf16 %v1991_v28, %v1990_v27  ;;  %v2024_v28 = vld [vmem:[%s4316_s3 + $0x310] sm:$0xff] }
 0x122   :  { %3142 = vmatprep.subr.bf16.mxu1 %v3560_v3  ;;  %2846 = vmatprep.mubr.msk.f32.mxu0 %vm3561_vm0, %v3562_v51 }
 0x123   :  { %2531 = vmatprep.mubr.msk.f32.mxu1 %vm3561_vm0, %v3562_v51 }
 0x124   :  { %3360 = vmatpush3.bf16.msra.mxu0 %v3359_v37 }
 0x125   :  { %3144 = vmatpush3.bf16.msra.mxu1 %v3359_v37  ;;  %3361 = vmatprep.subr.bf16.mxu0 %v3560_v3  ;;  %v3407_v37 = vpack.c.bf16 %v1993_v34, %v1992_v33  ;;  %v2026_v33 = vld [vmem:[%s4316_s3 + $0x320] sm:$0xff]  ;;  %v2027_v34 = vld [vmem:[%s4316_s3 + $0x328] sm:$0xff] }
 0x126   :  { %3145 = vmatprep.subr.bf16.mxu1 %v3560_v3 }
 0x128   :  { %3363 = vmatpush3.bf16.msra.mxu0 %v3362_v40 }
 0x129   :  { %3147 = vmatpush3.bf16.msra.mxu1 %v3362_v40  ;;  %3364 = vmatprep.subr.bf16.mxu0 %v3560_v3  ;;  %v3410_v40 = vpack.c.bf16 %v1995_v39, %v1994_v38  ;;  %v2030_v39 = vld [vmem:[%s4316_s3 + $0x340] sm:$0xff] }
 0x12a   :  { %3148 = vmatprep.subr.bf16.mxu1 %v3560_v3 }
 0x12c   :  { %3366 = vmatpush3.bf16.msra.mxu0 %v3365_v43 }
 0x12d   :  { %3150 = vmatpush3.bf16.msra.mxu1 %v3365_v43  ;;  %3367 = vmatprep.subr.bf16.mxu0 %v3560_v3  ;;  %v3413_v43 = vpack.c.bf16 %v1997_v42, %v1996_v41  ;;  %v2032_v42 = vld [vmem:[%s4316_s3 + $0x350] sm:$0xff] }
 0x12e   :  { %3151 = vmatprep.subr.bf16.mxu1 %v3560_v3 }
 0x130   :  { %3369 = vmatpush3.bf16.msra.mxu0 %v3368_v46 }
 0x131   :  { %3153 = vmatpush3.bf16.msra.mxu1 %v3368_v46  ;;  %3370 = vmatprep.subr.bf16.mxu0 %v3560_v3  ;;  %v3416_v46 = vpack.c.bf16 %v1999_v45, %v1998_v44  ;;  %v2034_v45 = vld [vmem:[%s4316_s3 + $0x360] sm:$0xff] }
 0x132   :  { %3154 = vmatprep.subr.bf16.mxu1 %v3560_v3 }
 0x134   :  { %3372 = vmatpush3.bf16.msra.mxu0 %v3371_v49 }
 0x135   :  { %3156 = vmatpush3.bf16.msra.mxu1 %v3371_v49  ;;  %3373 = vmatprep.subr.bf16.mxu0 %v3560_v3  ;;  %v3419_v49 = vpack.c.bf16 %v2001_v48, %v2000_v47  ;;  %v2036_v48 = vld [vmem:[%s4316_s3 + $0x370] sm:$0xff] }
 0x136   :  { %3157 = vmatprep.subr.bf16.mxu1 %v3560_v3 }
 0x138   :  { %3375 = vmatpush3.bf16.msra.mxu0 %v3374_v53 }
 0x139   :  { %3159 = vmatpush3.bf16.msra.mxu1 %v3374_v53  ;;  %3376 = vmatprep.subr.bf16.mxu0 %v3560_v3  ;;  %v3422_v53 = vpack.c.bf16 %v2003_v52, %v2002_v50  ;;  %v2038_v52 = vld [vmem:[%s4316_s3 + $0x380] sm:$0xff] }
 0x13a   :  { %3160 = vmatprep.subr.bf16.mxu1 %v3560_v3 }
 0x13c   :  { %3378 = vmatpush3.bf16.msra.mxu0 %v3377_v56 }
 0x13d   :  { %3162 = vmatpush3.bf16.msra.mxu1 %v3377_v56  ;;  %3379 = vmatprep.subr.bf16.mxu0 %v3560_v3  ;;  %v3425_v56 = vpack.c.bf16 %v2005_v55, %v2004_v54  ;;  %v716_v54 = vrot.slane %v3562_v51, 2  ;;  %v1549_v55 = vrot.slane %v3726_v59, 2 }
 0x13e   :  { %3163 = vmatprep.subr.bf16.mxu1 %v3560_v3 }
 0x13f   :  { %2847 = vmatmul.mubr.f32.vlgmr.msra.gmra.mrb[2].mxu0 %v1190_v4  ;;  %v3434_v4 = vpack.c.bf16 %v2011_v2, %v2010_v1  ;;  %v2042_v1 = vld [vmem:[%s4316_s3 + $0x3a0] sm:$0xff]  ;;  %v2043_v2 = vld [vmem:[%s4316_s3 + $0x3a8] sm:$0xff] }
 0x140   :  { %2532 = vmatmul.mubr.f32.vlgmr.msra.gmra.mrb[0].mxu1 %v349_v5  ;;  %3381 = vmatpush3.bf16.msra.mxu0 %v3380_v0  ;;  %v2012_v5 = vld [vmem:[%s4316_s3 + $0x2b0] sm:$0xff] }
 0x141   :  { %3165 = vmatpush3.bf16.msra.mxu1 %v3380_v0  ;;  %3382 = vmatprep.subr.bf16.mxu0 %v3560_v3  ;;  %v3431_v0 = vpack.c.bf16 %v2009_v63, %v2008_v62  ;;  %v1551_v62 = vsel %vm714_vm6, %v1549_v55, %v716_v54 }
 0x142   :  { %3166 = vmatprep.subr.bf16.mxu1 %v3560_v3  ;;  %2881 = vmatprep.mubr.msk.f32.mxu0 %vm3561_vm0, %v3562_v51 }
 0x143   :  { %2566 = vmatprep.mubr.msk.f32.mxu1 %vm3561_vm0, %v3562_v51 }
 0x144   :  { %3384 = vmatpush3.bf16.msra.mxu0 %v3383_v6 }
 0x145   :  { %3168 = vmatpush3.bf16.msra.mxu1 %v3383_v6  ;;  %3385 = vmatprep.subr.bf16.mxu0 %v3560_v3  ;;  %v2013_v6 = vld [vmem:[%s4316_s3 + $0x2b8] sm:$0xff] }
 0x146   :  { %3169 = vmatprep.subr.bf16.mxu1 %v3560_v3  ;;  %v3437_v7 = vpack.c.bf16 %v2013_v6, %v2012_v5  ;;  %v2044_v5 = vld [vmem:[%s4316_s3 + $0x3b0] sm:$0xff]  ;;  %v2045_v6 = vld [vmem:[%s4316_s3 + $0x3b8] sm:$0xff] }
 0x148   :  { %3387 = vmatpush3.bf16.msra.mxu0 %v3386_v10 }
 0x149   :  { %3171 = vmatpush3.bf16.msra.mxu1 %v3386_v10  ;;  %3388 = vmatprep.subr.bf16.mxu0 %v3560_v3  ;;  %v2015_v10 = vld [vmem:[%s4316_s3 + $0x2c8] sm:$0xff] }
 0x14a   :  { %3172 = vmatprep.subr.bf16.mxu1 %v3560_v3  ;;  %v3440_v12 = vpack.c.bf16 %v2015_v10, %v2014_v8  ;;  %v2046_v8 = vld [vmem:[%s4316_s3 + $0x3c0] sm:$0xff]  ;;  %v2047_v10 = vld [vmem:[%s4316_s3 + $0x3c8] sm:$0xff] }
 0x14c   :  { %3390 = vmatpush3.bf16.msra.mxu0 %v3389_v14 }
 0x14d   :  { %3174 = vmatpush3.bf16.msra.mxu1 %v3389_v14  ;;  %3391 = vmatprep.subr.bf16.mxu0 %v3560_v3  ;;  %v2017_v14 = vld [vmem:[%s4316_s3 + $0x2d8] sm:$0xff] }
 0x14e   :  { %3175 = vmatprep.subr.bf16.mxu1 %v3560_v3  ;;  %v3443_v15 = vpack.c.bf16 %v2017_v14, %v2016_v13  ;;  %v2048_v13 = vld [vmem:[%s4316_s3 + $0x3d0] sm:$0xff]  ;;  %v2049_v14 = vld [vmem:[%s4316_s3 + $0x3d8] sm:$0xff] }
 0x150   :  { %3393 = vmatpush3.bf16.msra.mxu0 %v3392_v17 }
 0x151   :  { %3177 = vmatpush3.bf16.msra.mxu1 %v3392_v17  ;;  %3394 = vmatprep.subr.bf16.mxu0 %v3560_v3  ;;  %v2019_v17 = vld [vmem:[%s4316_s3 + $0x2e8] sm:$0xff] }
 0x152   :  { %3178 = vmatprep.subr.bf16.mxu1 %v3560_v3  ;;  %v3446_v18 = vpack.c.bf16 %v2019_v17, %v2018_v16  ;;  %v2050_v16 = vld [vmem:[%s4316_s3 + $0x3e0] sm:$0xff]  ;;  %v2051_v17 = vld [vmem:[%s4316_s3 + $0x3e8] sm:$0xff] }
 0x154   :  { %3396 = vmatpush3.bf16.msra.mxu0 %v3395_v20 }
 0x155   :  { %3180 = vmatpush3.bf16.msra.mxu1 %v3395_v20  ;;  %3397 = vmatprep.subr.bf16.mxu0 %v3560_v3  ;;  %v2021_v20 = vld [vmem:[%s4316_s3 + $0x2f8] sm:$0xff] }
 0x156   :  { %3181 = vmatprep.subr.bf16.mxu1 %v3560_v3  ;;  %v3449_v21 = vpack.c.bf16 %v2021_v20, %v2020_v19  ;;  %v2052_v19 = vld [vmem:[%s4316_s3 + $0x3f0] sm:$0xff]  ;;  %v2053_v20 = vld [vmem:[%s4316_s3 + $0x3f8] sm:$0xff] }
 0x158   :  { %3399 = vmatpush3.bf16.msra.mxu0 %v3398_v23 }
 0x159   :  { %3183 = vmatpush3.bf16.msra.mxu1 %v3398_v23  ;;  %3400 = vmatprep.subr.bf16.mxu0 %v3560_v3  ;;  %v2023_v23 = vld [vmem:[%s4316_s3 + $0x308] sm:$0xff] }
 0x15a   :  { %3184 = vmatprep.subr.bf16.mxu1 %v3560_v3  ;;  %v3452_v27 = vpack.c.bf16 %v2023_v23, %v2022_v22  ;;  %v2054_v22 = vld [vmem:[%s4316_s3 + $0x400] sm:$0xff]  ;;  %v2055_v23 = vld [vmem:[%s4316_s3 + $0x408] sm:$0xff] }
 0x15c   :  { %3402 = vmatpush3.bf16.msra.mxu0 %v3401_v26 }
 0x15d   :  { %3186 = vmatpush3.bf16.msra.mxu1 %v3401_v26  ;;  %3403 = vmatprep.subr.bf16.mxu0 %v3560_v3  ;;  %v622_v26 = vrot.slane %v3729_v61, 1 }
 0x15e   :  { %3187 = vmatprep.subr.bf16.mxu1 %v3560_v3 }
 0x15f   :  { %2882 = vmatmul.mubr.f32.vlgmr.msra.gmra.mrb[2].mxu0 %v1281_v35  ;;  %v624_v31 = vsel %vm621_vm5, %v622_v26, %v623_v24  ;;  %v3458_v35 = vpack.c.bf16 %v2027_v34, %v2026_v33  ;;  %v809_v24 = vrot.slane %v3562_v51, 3  ;;  %v808_v26 = vrot.slane %v3729_v61, 3  ;;  %v2060_v34 = vld [vmem:[%s4316_s3 + $0x430] sm:$0xff] }
 0x160   :  { %2567 = vmatmul.mubr.f32.vlgmr.msra.gmra.mrb[0].mxu1 %v442_v36  ;;  %3405 = vmatpush3.bf16.msra.mxu0 %v3404_v32  ;;  %v2028_v36 = vld [vmem:[%s4316_s3 + $0x330] sm:$0xff] }
 0x161   :  { %3189 = vmatpush3.bf16.msra.mxu1 %v3404_v32  ;;  %3406 = vmatprep.subr.bf16.mxu0 %v3560_v3  ;;  %v3455_v32 = vpack.c.bf16 %v2025_v29, %v2024_v28  ;;  %v2056_v28 = vld [vmem:[%s4316_s3 + $0x410] sm:$0xff]  ;;  %v2057_v29 = vld [vmem:[%s4316_s3 + $0x418] sm:$0xff] }
 0x162   :  { %3190 = vmatprep.subr.bf16.mxu1 %v3560_v3  ;;  %2916 = vmatprep.mubr.msk.f32.mxu0 %vm3561_vm0, %v3562_v51 }
 0x163   :  { %2601 = vmatprep.mubr.msk.f32.mxu1 %vm3561_vm0, %v3562_v51 }
 0x164   :  { %3408 = vmatpush3.bf16.msra.mxu0 %v3407_v37 }
 0x165   :  { %3192 = vmatpush3.bf16.msra.mxu1 %v3407_v37  ;;  %3409 = vmatprep.subr.bf16.mxu0 %v3560_v3  ;;  %v2029_v37 = vld [vmem:[%s4316_s3 + $0x338] sm:$0xff] }
 0x166   :  { %3193 = vmatprep.subr.bf16.mxu1 %v3560_v3  ;;  %v3461_v38 = vpack.c.bf16 %v2029_v37, %v2028_v36  ;;  %v2063_v37 = vld [vmem:[%s4316_s3 + $0x448] sm:$0xff] }
 0x168   :  { %3411 = vmatpush3.bf16.msra.mxu0 %v3410_v40 }
 0x169   :  { %3195 = vmatpush3.bf16.msra.mxu1 %v3410_v40  ;;  %3412 = vmatprep.subr.bf16.mxu0 %v3560_v3  ;;  %v2031_v40 = vld [vmem:[%s4316_s3 + $0x348] sm:$0xff] }
 0x16a   :  { %3196 = vmatprep.subr.bf16.mxu1 %v3560_v3  ;;  %v3464_v41 = vpack.c.bf16 %v2031_v40, %v2030_v39  ;;  %v2064_v39 = vld [vmem:[%s4316_s3 + $0x450] sm:$0xff]  ;;  %v2065_v40 = vld [vmem:[%s4316_s3 + $0x458] sm:$0xff] }
 0x16c   :  { %3414 = vmatpush3.bf16.msra.mxu0 %v3413_v43 }
 0x16d   :  { %3198 = vmatpush3.bf16.msra.mxu1 %v3413_v43  ;;  %3415 = vmatprep.subr.bf16.mxu0 %v3560_v3  ;;  %v2033_v43 = vld [vmem:[%s4316_s3 + $0x358] sm:$0xff] }
 0x16e   :  { %3199 = vmatprep.subr.bf16.mxu1 %v3560_v3  ;;  %v3467_v44 = vpack.c.bf16 %v2033_v43, %v2032_v42  ;;  %v2066_v42 = vld [vmem:[%s4316_s3 + $0x460] sm:$0xff]  ;;  %v2067_v43 = vld [vmem:[%s4316_s3 + $0x468] sm:$0xff] }
 0x170   :  { %3417 = vmatpush3.bf16.msra.mxu0 %v3416_v46 }
 0x171   :  { %3201 = vmatpush3.bf16.msra.mxu1 %v3416_v46  ;;  %3418 = vmatprep.subr.bf16.mxu0 %v3560_v3  ;;  %v2035_v46 = vld [vmem:[%s4316_s3 + $0x368] sm:$0xff] }
 0x172   :  { %3202 = vmatprep.subr.bf16.mxu1 %v3560_v3  ;;  %v3470_v47 = vpack.c.bf16 %v2035_v46, %v2034_v45  ;;  %v2068_v45 = vld [vmem:[%s4316_s3 + $0x470] sm:$0xff]  ;;  %v2069_v46 = vld [vmem:[%s4316_s3 + $0x478] sm:$0xff] }
 0x174   :  { %3420 = vmatpush3.bf16.msra.mxu0 %v3419_v49 }
 0x175   :  { %3204 = vmatpush3.bf16.msra.mxu1 %v3419_v49  ;;  %3421 = vmatprep.subr.bf16.mxu0 %v3560_v3  ;;  %v2037_v49 = vld [vmem:[%s4316_s3 + $0x378] sm:$0xff] }
 0x176   :  { %3205 = vmatprep.subr.bf16.mxu1 %v3560_v3  ;;  %v3473_v50 = vpack.c.bf16 %v2037_v49, %v2036_v48  ;;  %v1941_v48 = vld [vmem:[%s4318_s4] ss:$0 sm:$0xff]  ;;  %v980_v49 = vld [vmem:[%s4315_s0 + $0x8] sm:$0xff] }
 0x178   :  { %3423 = vmatpush3.bf16.msra.mxu0 %v3422_v53 }
 0x179   :  { %3207 = vmatpush3.bf16.msra.mxu1 %v3422_v53  ;;  %3424 = vmatprep.subr.bf16.mxu0 %v3560_v3  ;;  %v2039_v53 = vld [vmem:[%s4316_s3 + $0x388] sm:$0xff] }
 0x17a   :  { %3208 = vmatprep.subr.bf16.mxu1 %v3560_v3  ;;  %v3476_v57 = vpack.c.bf16 %v2039_v53, %v2038_v52  ;;  %v987_v52 = vadd.f32 %v1941_v48, %v980_v49 }
 0x17c   :  { %3426 = vmatpush3.bf16.msra.mxu0 %v3425_v56 }
 0x17d   :  { %3210 = vmatpush3.bf16.msra.mxu1 %v3425_v56  ;;  %3427 = vmatprep.subr.bf16.mxu0 %v3560_v3  ;;  %v715_v56 = vrot.slane %v3729_v61, 2 }
 0x17e   :  { %3211 = vmatprep.subr.bf16.mxu1 %v3560_v3 }
 0x17f   :  { %2917 = vmatmul.mubr.f32.vlgmr.msra.gmra.mrb[2].mxu0 %v3726_v59  ;;  %v717_v63 = vsel %vm714_vm6, %v715_v56, %v716_v54  ;;  %v810_v59 = vsel %vm807_vm7, %v808_v26, %v809_v24 }
 0x180   :  { %2602 = vmatmul.mubr.f32.vlgmr.msra.gmra.mrb[0].mxu1 %v3729_v61  ;;  %3429 = vmatpush3.bf16.msra.mxu0 %v3428_v60  ;;  %v3503_v61 = vpack.c.bf16 %v2057_v29, %v2056_v28 }
 0x181   :  { %3213 = vmatpush3.bf16.msra.mxu1 %v3428_v60  ;;  %3430 = vmatprep.subr.bf16.mxu0 %v3560_v3  ;;  %v2041_v60 = vld [vmem:[%s4316_s3 + $0x398] sm:$0xff] }
 0x182   :  { %3214 = vmatprep.subr.bf16.mxu1 %v3560_v3  ;;  %2951 = vmatprep.mubr.msk.f32.mxu0 %vm3561_vm0, %v3562_v51 }
 0x183   :  { %2636 = vmatprep.mubr.msk.f32.mxu1 %vm3561_vm0, %v3562_v51 }
 0x184   :  { %3432 = vmatpush3.bf16.msra.mxu0 %v3431_v0 }
 0x185   :  { %3216 = vmatpush3.bf16.msra.mxu1 %v3431_v0  ;;  %3433 = vmatprep.subr.bf16.mxu0 %v3560_v3  ;;  %v3479_v0 = vpack.c.bf16 %v2041_v60, %v2040_v58 }
 0x186   :  { %3217 = vmatprep.subr.bf16.mxu1 %v3560_v3 }
 0x188   :  { %3435 = vmatpush3.bf16.msra.mxu0 %v3434_v4 }
 0x189   :  { %3219 = vmatpush3.bf16.msra.mxu1 %v3434_v4  ;;  %3436 = vmatprep.subr.bf16.mxu0 %v3560_v3  ;;  %v3482_v4 = vpack.c.bf16 %v2043_v2, %v2042_v1 }
 0x18a   :  { %3220 = vmatprep.subr.bf16.mxu1 %v3560_v3 }
 0x18c   :  { %3438 = vmatpush3.bf16.msra.mxu0 %v3437_v7 }
 0x18d   :  { %3222 = vmatpush3.bf16.msra.mxu1 %v3437_v7  ;;  %3439 = vmatprep.subr.bf16.mxu0 %v3560_v3  ;;  %v3485_v7 = vpack.c.bf16 %v2045_v6, %v2044_v5 }
 0x18e   :  { %3223 = vmatprep.subr.bf16.mxu1 %v3560_v3 }
 0x190   :  { %3441 = vmatpush3.bf16.msra.mxu0 %v3440_v12 }
 0x191   :  { %3225 = vmatpush3.bf16.msra.mxu1 %v3440_v12  ;;  %3442 = vmatprep.subr.bf16.mxu0 %v3560_v3  ;;  %v3488_v12 = vpack.c.bf16 %v2047_v10, %v2046_v8 }
 0x192   :  { %3226 = vmatprep.subr.bf16.mxu1 %v3560_v3 }
 0x194   :  { %3444 = vmatpush3.bf16.msra.mxu0 %v3443_v15 }
 0x195   :  { %3228 = vmatpush3.bf16.msra.mxu1 %v3443_v15  ;;  %3445 = vmatprep.subr.bf16.mxu0 %v3560_v3  ;;  %v3491_v15 = vpack.c.bf16 %v2049_v14, %v2048_v13 }
 0x196   :  { %3229 = vmatprep.subr.bf16.mxu1 %v3560_v3 }
 0x198   :  { %3447 = vmatpush3.bf16.msra.mxu0 %v3446_v18 }
 0x199   :  { %3231 = vmatpush3.bf16.msra.mxu1 %v3446_v18  ;;  %3448 = vmatprep.subr.bf16.mxu0 %v3560_v3  ;;  %v3494_v18 = vpack.c.bf16 %v2051_v17, %v2050_v16 }
 0x19a   :  { %3232 = vmatprep.subr.bf16.mxu1 %v3560_v3 }
 0x19c   :  { %3450 = vmatpush3.bf16.msra.mxu0 %v3449_v21 }
 0x19d   :  { %3234 = vmatpush3.bf16.msra.mxu1 %v3449_v21  ;;  %3451 = vmatprep.subr.bf16.mxu0 %v3560_v3  ;;  %v3497_v21 = vpack.c.bf16 %v2053_v20, %v2052_v19 }
 0x19e   :  { %3235 = vmatprep.subr.bf16.mxu1 %v3560_v3 }
 0x19f   :  { %2952 = vmatmul.mubr.f32.vlgmr.msra.gmra.mrb[2].mxu0 %v1460_v30  ;;  %v1642_v30 = vsel %vm807_vm7, %v1640_v25, %v809_v24 }
 0x1a0   :  { %2637 = vmatmul.mubr.f32.vlgmr.msra.gmra.mrb[0].mxu1 %v624_v31  ;;  %3453 = vmatpush3.bf16.msra.mxu0 %v3452_v27  ;;  %v2058_v31 = vld [vmem:[%s4316_s3 + $0x420] sm:$0xff] }
 0x1a1   :  { %3237 = vmatpush3.bf16.msra.mxu1 %v3452_v27  ;;  %3454 = vmatprep.subr.bf16.mxu0 %v3560_v3  ;;  %v3500_v27 = vpack.c.bf16 %v2055_v23, %v2054_v22 }
 0x1a2   :  { %3238 = vmatprep.subr.bf16.mxu1 %v3560_v3  ;;  %2986 = vmatprep.mubr.msk.f32.mxu0 %vm3561_vm0, %v3562_v51 }
 0x1a3   :  { %2671 = vmatprep.mubr.msk.f32.mxu1 %vm3561_vm0, %v3562_v51 }
 0x1a4   :  { %3456 = vmatpush3.bf16.msra.mxu0 %v3455_v32 }
 0x1a5   :  { %3240 = vmatpush3.bf16.msra.mxu1 %v3455_v32  ;;  %3457 = vmatprep.subr.bf16.mxu0 %v3560_v3  ;;  %v2059_v32 = vld [vmem:[%s4316_s3 + $0x428] sm:$0xff] }
 0x1a6   :  { %3241 = vmatprep.subr.bf16.mxu1 %v3560_v3  ;;  %v3506_v33 = vpack.c.bf16 %v2059_v32, %v2058_v31 }
 0x1a8   :  { %3459 = vmatpush3.bf16.msra.mxu0 %v3458_v35 }
 0x1a9   :  { %3243 = vmatpush3.bf16.msra.mxu1 %v3458_v35  ;;  %3460 = vmatprep.subr.bf16.mxu0 %v3560_v3  ;;  %v2061_v35 = vld [vmem:[%s4316_s3 + $0x438] sm:$0xff] }
 0x1aa   :  { %3244 = vmatprep.subr.bf16.mxu1 %v3560_v3  ;;  %v3509_v36 = vpack.c.bf16 %v2061_v35, %v2060_v34 }
 0x1ac   :  { %3462 = vmatpush3.bf16.msra.mxu0 %v3461_v38 }
 0x1ad   :  { %3246 = vmatpush3.bf16.msra.mxu1 %v3461_v38  ;;  %3463 = vmatprep.subr.bf16.mxu0 %v3560_v3 }
 0x1ae   :  { %3247 = vmatprep.subr.bf16.mxu1 %v3560_v3 }
 0x1b0   :  { %3465 = vmatpush3.bf16.msra.mxu0 %v3464_v41 }
 0x1b1   :  { %3249 = vmatpush3.bf16.msra.mxu1 %v3464_v41  ;;  %3466 = vmatprep.subr.bf16.mxu0 %v3560_v3  ;;  %v3515_v41 = vpack.c.bf16 %v2065_v40, %v2064_v39 }
 0x1b2   :  { %3250 = vmatprep.subr.bf16.mxu1 %v3560_v3 }
 0x1b4   :  { %3468 = vmatpush3.bf16.msra.mxu0 %v3467_v44 }
 0x1b5   :  { %3252 = vmatpush3.bf16.msra.mxu1 %v3467_v44  ;;  %3469 = vmatprep.subr.bf16.mxu0 %v3560_v3  ;;  %v3518_v44 = vpack.c.bf16 %v2067_v43, %v2066_v42 }
 0x1b6   :  { %3253 = vmatprep.subr.bf16.mxu1 %v3560_v3 }
 0x1b8   :  { %3471 = vmatpush3.bf16.msra.mxu0 %v3470_v47 }
 0x1b9   :  { %3255 = vmatpush3.bf16.msra.mxu1 %v3470_v47  ;;  %3472 = vmatprep.subr.bf16.mxu0 %v3560_v3  ;;  %v3521_v47 = vpack.c.bf16 %v2069_v46, %v2068_v45 }
 0x1ba   :  { %3256 = vmatprep.subr.bf16.mxu1 %v3560_v3 }
 0x1bc   :  { %3474 = vmatpush3.bf16.msra.mxu0 %v3473_v50 }
 0x1bd   :  { %3258 = vmatpush3.bf16.msra.mxu1 %v3473_v50  ;;  %3475 = vmatprep.subr.bf16.mxu0 %v3560_v3  ;;  %v134_v50 = vld [vmem:[%s4315_s0] sm:$0xff] }
 0x1be   :  { %3259 = vmatprep.subr.bf16.mxu1 %v3560_v3 }
 0x1bf   :  { %2987 = vmatmul.mubr.f32.vlgmr.msra.gmra.mrb[2].mxu0 %v1551_v62 }
 0x1c0   :  { %2672 = vmatmul.mubr.f32.vlgmr.msra.gmra.mrb[0].mxu1 %v717_v63  ;;  %3477 = vmatpush3.bf16.msra.mxu0 %v3476_v57 }
 0x1c1   :  { %3261 = vmatpush3.bf16.msra.mxu1 %v3476_v57  ;;  %3478 = vmatprep.subr.bf16.mxu0 %v3560_v3 }
 0x1c2   :  { %3262 = vmatprep.subr.bf16.mxu1 %v3560_v3  ;;  %3021 = vmatprep.mubr.msk.f32.mxu0 %vm3561_vm0, %v3562_v51 }
 0x1c3   :  { %2706 = vmatprep.mubr.msk.f32.mxu1 %vm3561_vm0, %v3562_v51 }
 0x1c4   :  { %3480 = vmatpush3.bf16.msra.mxu0 %v3479_v0 }
 0x1c5   :  { %3264 = vmatpush3.bf16.msra.mxu1 %v3479_v0  ;;  %3481 = vmatprep.subr.bf16.mxu0 %v3560_v3 }
 0x1c6   :  { %3265 = vmatprep.subr.bf16.mxu1 %v3560_v3 }
 0x1c8   :  { %3483 = vmatpush3.bf16.msra.mxu0 %v3482_v4 }
 0x1c9   :  { %3267 = vmatpush3.bf16.msra.mxu1 %v3482_v4  ;;  %3484 = vmatprep.subr.bf16.mxu0 %v3560_v3 }
 0x1ca   :  { %3268 = vmatprep.subr.bf16.mxu1 %v3560_v3 }
 0x1cc   :  { %3486 = vmatpush3.bf16.msra.mxu0 %v3485_v7 }
 0x1cd   :  { %3270 = vmatpush3.bf16.msra.mxu1 %v3485_v7  ;;  %3487 = vmatprep.subr.bf16.mxu0 %v3560_v3 }
 0x1ce   :  { %3271 = vmatprep.subr.bf16.mxu1 %v3560_v3 }
 0x1d0   :  { %3489 = vmatpush3.bf16.msra.mxu0 %v3488_v12 }
 0x1d1   :  { %3273 = vmatpush3.bf16.msra.mxu1 %v3488_v12  ;;  %3490 = vmatprep.subr.bf16.mxu0 %v3560_v3 }
 0x1d2   :  { %3274 = vmatprep.subr.bf16.mxu1 %v3560_v3 }
 0x1d4   :  { %3492 = vmatpush3.bf16.msra.mxu0 %v3491_v15 }
 0x1d5   :  { %3276 = vmatpush3.bf16.msra.mxu1 %v3491_v15  ;;  %3493 = vmatprep.subr.bf16.mxu0 %v3560_v3 }
 0x1d6   :  { %3277 = vmatprep.subr.bf16.mxu1 %v3560_v3 }
 0x1d8   :  { %3495 = vmatpush3.bf16.msra.mxu0 %v3494_v18 }
 0x1d9   :  { %3279 = vmatpush3.bf16.msra.mxu1 %v3494_v18  ;;  %3496 = vmatprep.subr.bf16.mxu0 %v3560_v3 }
 0x1da   :  { %3280 = vmatprep.subr.bf16.mxu1 %v3560_v3 }
 0x1dc   :  { %3498 = vmatpush3.bf16.msra.mxu0 %v3497_v21 }
 0x1dd   :  { %3282 = vmatpush3.bf16.msra.mxu1 %v3497_v21  ;;  %3499 = vmatprep.subr.bf16.mxu0 %v3560_v3 }
 0x1de   :  { %3283 = vmatprep.subr.bf16.mxu1 %v3560_v3 }
 0x1df   :  { %3022 = vmatmul.mubr.f32.vlgmr.msra.gmra.mrb[2].mxu0 %v1642_v30 }
 0x1e0   :  { %2707 = vmatmul.mubr.f32.vlgmr.msra.gmra.mrb[0].mxu1 %v810_v59  ;;  %3501 = vmatpush3.bf16.msra.mxu0 %v3500_v27 }
 0x1e1   :  { %3285 = vmatpush3.bf16.msra.mxu1 %v3500_v27  ;;  %3502 = vmatprep.subr.bf16.mxu0 %v3560_v3 }
 0x1e2   :  { %3286 = vmatprep.subr.bf16.mxu1 %v3560_v3  ;;  %3056 = vmatprep.mubr.msk.f32.mxu0 %vm3561_vm0, %v3562_v51 }
 0x1e3   :  { %2741 = vmatprep.mubr.msk.f32.mxu1 %vm3561_vm0, %v3562_v51  ;;  %v2062_v51 = vld [vmem:[%s4316_s3 + $0x440] sm:$0xff] }
 0x1e4   :  { %3504 = vmatpush3.bf16.msra.mxu0 %v3503_v61  ;;  %v3512_v38 = vpack.c.bf16 %v2063_v37, %v2062_v51 }
 0x1e5   :  { %3288 = vmatpush3.bf16.msra.mxu1 %v3503_v61  ;;  %3505 = vmatprep.subr.bf16.mxu0 %v3560_v3 }
 0x1e6   :  { %3289 = vmatprep.subr.bf16.mxu1 %v3560_v3 }
 0x1e8   :  { %3507 = vmatpush3.bf16.msra.mxu0 %v3506_v33 }
 0x1e9   :  { %3291 = vmatpush3.bf16.msra.mxu1 %v3506_v33  ;;  %3508 = vmatprep.subr.bf16.mxu0 %v3560_v3 }
 0x1ea   :  { %3292 = vmatprep.subr.bf16.mxu1 %v3560_v3 }
 0x1ec   :  { %3510 = vmatpush3.bf16.msra.mxu0 %v3509_v36 }
 0x1ed   :  { %3294 = vmatpush3.bf16.msra.mxu1 %v3509_v36  ;;  %3511 = vmatprep.subr.bf16.mxu0 %v3560_v3 }
 0x1ee   :  { %3295 = vmatprep.subr.bf16.mxu1 %v3560_v3 }
 0x1f0   :  { %3513 = vmatpush3.bf16.msra.mxu0 %v3512_v38 }
 0x1f1   :  { %3297 = vmatpush3.bf16.msra.mxu1 %v3512_v38  ;;  %3514 = vmatprep.subr.bf16.mxu0 %v3560_v3 }
 0x1f2   :  { %3298 = vmatprep.subr.bf16.mxu1 %v3560_v3 }
 0x1f4   :  { %3516 = vmatpush3.bf16.msra.mxu0 %v3515_v41 }
 0x1f5   :  { %3300 = vmatpush3.bf16.msra.mxu1 %v3515_v41  ;;  %3517 = vmatprep.subr.bf16.mxu0 %v3560_v3 }
 0x1f6   :  { %3301 = vmatprep.subr.bf16.mxu1 %v3560_v3 }
 0x1f8   :  { %3519 = vmatpush3.bf16.msra.mxu0 %v3518_v44 }
 0x1f9   :  { %3303 = vmatpush3.bf16.msra.mxu1 %v3518_v44  ;;  %3520 = vmatprep.subr.bf16.mxu0 %v3560_v3 }
 0x1fa   :  { %3304 = vmatprep.subr.bf16.mxu1 %v3560_v3  ;;  %v141_v3 = vadd.f32 %v1941_v48, %v134_v50 }
 0x1fc   :  { %3522 = vmatpush3.bf16.msra.mxu0 %v3521_v47 }
 0x1fd   :  { %3306 = vmatpush3.bf16.msra.mxu1 %v3521_v47 }
 0x1ff   :  { %3057 = vmatmul.mubr.f32.vlgmr.msra.gmra.mrb[2].mxu0 %v3749_v9 }
 0x200   :  { %2742 = vmatmul.mubr.f32.vlgmr.msra.gmra.mrb[0].mxu1 %v3757_v11 }
 0x2d2   :  { %v1800_v53 = vpop.f32.mrb[2].mxu0 }
 0x2d3   :  { %v3524_v54 = vadd.f32 %v1800_v53, %v987_v52  ;;  %v969_v55 = vpop.f32.mrb[0].mxu1  ;;  %v3058_v9 = vpop.f32.mrb[3].mxu0 }
 0x2d4   :  { %v3523_v56 = vadd.f32 %v969_v55, %v141_v3  ;;  %v2743_v11 = vpop.f32.mrb[1].mxu1 }
 0x2d5   :  { %v1805_v57 = vmax.f32 %v3524_v54, 0.0 }
 0x2d6   :  { %v974_v58 = vmax.f32 %v3523_v56, 0.0 }
 0x2d7   :  { %1806 = vst [vmem:[%s4319_s5 + $0x8] sm:$0xff] %v1805_v57 }
 0x2d8   :  { %975 = vst [vmem:[%s4319_s5] sm:$0xff] %v974_v58 }

</bundles_post_ra>
